<compile_context>
chip_gen: v6e
topology: v6e:2x2x1
jax: 0.10.0
libtpu: 0.0.40
codegen_flags: <defaults>
</compile_context>

<pallas_src>
import numpy as np

import jax
import jax.numpy as jnp
from jax import lax
from jax.experimental import pallas as pl
from jax.experimental.pallas import tpu as pltpu


# ----------------------------------------------------------------------------
# Pallas kernel
# ----------------------------------------------------------------------------
def _make_crash_kernel(H, W, F, dils, couts, base, Lp):
    HW = H * W
    G = len(dils)

    def kernel(x_ref, w_ref, b_ref, m_ref, o_ref, xp_ref, slab_ref):
        # In-kernel zero pad + f32->bf16 cast: one small VMEM copy instead of
        # wrapper-side jnp.pad / astype HBM passes.  (Zeroed every step so it
        # is correct no matter how the parallel grid axis is split over cores.)
        xp_ref[...] = jnp.zeros_like(xp_ref)
        xp_ref[:, base:base + HW] = x_ref[0].astype(jnp.bfloat16)

        outs = []
        for g in range(G):                      # static unroll over groups
            d = dils[g]
            # Stage the per-group im2col slab (9*F, HW): 9 contiguous,
            # lane-dense slices of the padded flat image.  The W-boundary mask
            # is fused into the staging store (dx == 0 taps need no mask).
            for ky in range(3):
                for kx in range(3):
                    off = base + (ky - 1) * d * W + (kx - 1) * d
                    sl = xp_ref[:, off:off + HW]                    # (F, HW) bf16
                    if kx != 1:
                        sl = sl * m_ref[3 * g + kx:3 * g + kx + 1, :]
                    r = (3 * ky + kx) * F
                    slab_ref[r:r + F, :] = sl
            # One MXU matmul per group: K = 9*Cin, N = H*W on the lane dim,
            # f32 accumulation.  Result lands directly in the group's output
            # channel rows (no zero-padded weight blocks, no relayout).
            acc = jnp.dot(w_ref[g], slab_ref[...],
                          preferred_element_type=jnp.float32)       # (cmax, HW)
            outs.append(acc[:couts[g]])

        out = jnp.concatenate(outs, axis=0) + b_ref[...]            # (F,HW)+(F,1)
        o_ref[0] = out.astype(o_ref.dtype)

    return kernel


# ----------------------------------------------------------------------------
# Wrapper: NCHW in / NCHW out (reshapes only, no extra HBM passes)
# ----------------------------------------------------------------------------
def crash_layer(x_nchw, w_packed, b_vec, dils, couts):
    B, F, H, W = x_nchw.shape
    G = len(dils)
    HW = H * W
    Dmax = max(dils)
    cmax = w_packed.shape[1]
    base = Dmax * W + Dmax                                   # flat offset of (0,0)
    Lp = -(-((H + 2 * Dmax) * W + 2 * Dmax) // 128) * 128    # padded flat length

    # 0/1 column masks for the W boundary of each (group, kx) tap:
    # valid iff 0 <= x + (kx-1)*d < W.  Tiny trace-time constant.
    xs = np.arange(HW) % W
    masks_np = np.zeros((3 * G, HW), np.float32)
    for g, d in enumerate(dils):
        for kx in range(3):
            dx = (kx - 1) * d
            masks_np[3 * g + kx] = ((xs + dx >= 0) & (xs + dx < W)).astype(np.float32)
    masks = jnp.asarray(masks_np, dtype=jnp.bfloat16)

    kernel = _make_crash_kernel(H, W, F, tuple(dils), tuple(couts), base, Lp)

    # Cost estimate with real MACs only (no zero-padded weight blocks).
    flops = 2 * B * HW * 9 * F * int(sum(couts))
    bytes_accessed = (B * F * HW * 4 + B * F * HW * 4
                      + w_packed.size * 2 + masks.size * 2 + b_vec.size * 4)

    # VMEM budget derived from the actual blocks (double-buffered) + scratch.
    vmem_est = (2 * 2 * F * HW * 4                                  # x/out blocks
                + 2 * (w_packed.size * 2 + masks.size * 2 + b_vec.size * 4)
                + F * Lp * 2 + 9 * F * HW * 2)                      # scratch
    vmem_limit = int(min(64 * 1024 * 1024, max(16 * 1024 * 1024, 4 * vmem_est)))

    out = pl.pallas_call(
        kernel,
        out_shape=jax.ShapeDtypeStruct((B, F, HW), x_nchw.dtype),
        grid=(B,),
        in_specs=[
            pl.BlockSpec((1, F, HW), lambda b: (b, 0, 0)),
            # Constant operands: index maps don't depend on the grid, so the
            # pipeline never re-fetches them.
            pl.BlockSpec((G, cmax, 9 * F), lambda b: (0, 0, 0)),
            pl.BlockSpec((F, 1), lambda b: (0, 0)),
            pl.BlockSpec((3 * G, HW), lambda b: (0, 0)),
        ],
        out_specs=pl.BlockSpec((1, F, HW), lambda b: (b, 0, 0)),
        scratch_shapes=[
            pltpu.VMEM((F, Lp), jnp.bfloat16),        # zero-padded flat image
            pltpu.VMEM((9 * F, HW), jnp.bfloat16),    # per-group im2col slab
        ],
        compiler_params=pltpu.CompilerParams(
            # One batch element per TensorCore on v7x; serial loop on v5e/v6e.
            dimension_semantics=("parallel",),
            vmem_limit_bytes=vmem_limit),
        cost_estimate=pl.CostEstimate(
            flops=flops, transcendentals=0, bytes_accessed=bytes_accessed),
    )(x_nchw.reshape(B, F, HW), w_packed, b_vec, masks)

    return out.reshape(B, F, H, W)


# ----------------------------------------------------------------------------
# Deterministic per-group parameters (PyTorch Conv2d OIHW layout) + packing
# ----------------------------------------------------------------------------
def init_crash_params(key, feats, num_depths):
    ws, bs = [], []
    keys = jax.random.split(key, 2 * num_depths)
    for n in range(num_depths):
        cout = feats * (n + 1) // num_depths - feats * n // num_depths
        ws.append(0.1 * jax.random.normal(keys[2 * n], (cout, feats, 3, 3), jnp.float32))
        bs.append(0.1 * jax.random.normal(keys[2 * n + 1], (cout,), jnp.float32))
    return ws, bs


def pack_crash_params(ws, bs):
    """Pack per-group weights to (G, cmax, 9*Cin) bf16 (row order ky,kx,cin —
    matches the im2col slab) and bias to (F, 1) f32.  Only the tiny cmax
    alignment columns are zero — no F-wide zero blocks."""
    G = len(ws)
    Cin = ws[0].shape[1]
    couts = [w.shape[0] for w in ws]
    cmax = max(couts)
    w_packed = jnp.zeros((G, cmax, 9 * Cin), jnp.float32)
    for g, w in enumerate(ws):
        wr = jnp.transpose(w, (0, 2, 3, 1)).reshape(couts[g], 9 * Cin)
        w_packed = w_packed.at[g, :couts[g]].set(wr)
    b_vec = jnp.concatenate(bs).reshape(-1, 1)
    return w_packed.astype(jnp.bfloat16), b_vec.astype(jnp.float32), couts


# ----------------------------------------------------------------------------
# Pure-JAX reference (lax.conv_general_dilated) for correctness checking
# ----------------------------------------------------------------------------
def ref_crash_layer(x_nchw, ws, bs, dils):
    outs = []
    for w, b, d in zip(ws, bs, dils):
        o = lax.conv_general_dilated(
            x_nchw, w, window_strides=(1, 1), padding=((d, d), (d, d)),
            rhs_dilation=(d, d), dimension_numbers=("NCHW", "OIHW", "NCHW"))
        outs.append(o + b[None, :, None, None])
    return jnp.concatenate(outs, axis=1)


if __name__ == "__main__":
    B, feats, H, W = 2, 8, 16, 16
    num_depths = 4                          # dilations 1, 2, 4, 8
    dils = tuple(2 ** n for n in range(num_depths))

    key = jax.random.PRNGKey(0)
    kx_, kp_ = jax.random.split(key)
    x = jax.random.normal(kx_, (B, feats, H, W), jnp.float32)
    ws, bs = init_crash_params(kp_, feats, num_depths)
    w_packed, b_vec, couts = pack_crash_params(ws, bs)

    out = crash_layer(x, w_packed, b_vec, dils, couts)
    out = jax.block_until_ready(out)

    ref = ref_crash_layer(x, ws, bs, dils)
    assert out.shape == x.shape
    max_err = float(jnp.max(jnp.abs(out - ref)))
    # bf16 matmul path vs f32 reference.
    assert jnp.allclose(out, ref, atol=5e-2, rtol=5e-2), max_err

    print("KERNEL_OK")
</pallas_src>

<mosaic_0001>
module attributes {stable_mosaic.version = 11 : i64} {
  func.func @kernel(%arg0: i32, %arg1: memref<1x8x256xf32, #tpu.memory_space<vmem>>, %arg2: memref<4x2x72xbf16, #tpu.memory_space<vmem>>, %arg3: memref<8x1xf32, #tpu.memory_space<vmem>>, %arg4: memref<12x256xbf16, #tpu.memory_space<vmem>>, %arg5: memref<1x8x256xf32, #tpu.memory_space<vmem>>, %arg6: memref<8x640xbf16, #tpu.memory_space<vmem>>, %arg7: memref<72x256xbf16, #tpu.memory_space<vmem>>) attributes {dimension_semantics = [#tpu.dimension_semantics<parallel>], iteration_bounds = array<i64: 2>, scalar_prefetch = 0 : i64, scratch_operands = 2 : i64, tpu.core_type = #tpu.core_type<tc>, window_params = [{transform_indices = @transform_0, window_bounds = array<i64: 1, 8, 256>}, {pipeline_mode = #tpu.pipeline_mode<synchronous>, transform_indices = @transform_1, window_bounds = array<i64: 4, 2, 72>}, {pipeline_mode = #tpu.pipeline_mode<synchronous>, transform_indices = @transform_2, window_bounds = array<i64: 8, 1>}, {pipeline_mode = #tpu.pipeline_mode<synchronous>, transform_indices = @transform_3, window_bounds = array<i64: 12, 256>}, {transform_indices = @transform_4, window_bounds = array<i64: 1, 8, 256>}]} {
    %cst = arith.constant 0.000000e+00 : bf16
    %0 = vector.broadcast %cst : bf16 to vector<8x640xbf16>
    %c0 = arith.constant 0 : index
    %c0_0 = arith.constant 0 : index
    %1 = vector.load %arg6[%c0, %c0_0] : memref<8x640xbf16, #tpu.memory_space<vmem>>, vector<8x640xbf16>
    tpu.vector_store %arg6[%c0, %c0_0], %0 {strides = array<i32>} : memref<8x640xbf16, #tpu.memory_space<vmem>>, vector<8x640xbf16>,
    %c0_1 = arith.constant 0 : index
    %c0_2 = arith.constant 0 : index
    %c0_3 = arith.constant 0 : index
    %2 = vector.load %arg1[%c0_1, %c0_2, %c0_3] : memref<1x8x256xf32, #tpu.memory_space<vmem>>, vector<1x8x256xf32>
    %3 = vector.shape_cast %2 : vector<1x8x256xf32> to vector<8x256xf32>
    %4 = arith.truncf %3 : vector<8x256xf32> to vector<8x256xbf16>
    %c0_4 = arith.constant 0 : index
    %c136 = arith.constant 136 : index
    %5 = vector.load %arg6[%c0_4, %c136] : memref<8x640xbf16, #tpu.memory_space<vmem>>, vector<8x256xbf16>
    tpu.vector_store %arg6[%c0_4, %c136], %4 {strides = array<i32>} : memref<8x640xbf16, #tpu.memory_space<vmem>>, vector<8x256xbf16>,
    %c0_5 = arith.constant 0 : index
    %c119 = arith.constant 119 : index
    %6 = vector.load %arg6[%c0_5, %c119] : memref<8x640xbf16, #tpu.memory_space<vmem>>, vector<8x256xbf16>
    %c0_6 = arith.constant 0 : index
    %c0_7 = arith.constant 0 : index
    %7 = vector.load %arg4[%c0_6, %c0_7] : memref<12x256xbf16, #tpu.memory_space<vmem>>, vector<1x256xbf16>
    %8 = vector.broadcast %7 : vector<1x256xbf16> to vector<8x256xbf16>
    %9 = arith.mulf %6, %8 : vector<8x256xbf16>
    %c0_8 = arith.constant 0 : index
    %c0_9 = arith.constant 0 : index
    %10 = vector.load %arg7[%c0_8, %c0_9] : memref<72x256xbf16, #tpu.memory_space<vmem>>, vector<8x256xbf16>
    tpu.vector_store %arg7[%c0_8, %c0_9], %9 {strides = array<i32>} : memref<72x256xbf16, #tpu.memory_space<vmem>>, vector<8x256xbf16>,
    %c0_10 = arith.constant 0 : index
    %c120 = arith.constant 120 : index
    %11 = vector.load %arg6[%c0_10, %c120] : memref<8x640xbf16, #tpu.memory_space<vmem>>, vector<8x256xbf16>
    %c8 = arith.constant 8 : index
    %c0_11 = arith.constant 0 : index
    %12 = vector.load %arg7[%c8, %c0_11] : memref<72x256xbf16, #tpu.memory_space<vmem>>, vector<8x256xbf16>
    tpu.vector_store %arg7[%c8, %c0_11], %11 {strides = array<i32>} : memref<72x256xbf16, #tpu.memory_space<vmem>>, vector<8x256xbf16>,
    %c0_12 = arith.constant 0 : index
    %c121 = arith.constant 121 : index
    %13 = vector.load %arg6[%c0_12, %c121] : memref<8x640xbf16, #tpu.memory_space<vmem>>, vector<8x256xbf16>
    %c2 = arith.constant 2 : index
    %c0_13 = arith.constant 0 : index
    %14 = vector.load %arg4[%c2, %c0_13] : memref<12x256xbf16, #tpu.memory_space<vmem>>, vector<1x256xbf16>
    %15 = vector.broadcast %14 : vector<1x256xbf16> to vector<8x256xbf16>
    %16 = arith.mulf %13, %15 : vector<8x256xbf16>
    %c16 = arith.constant 16 : index
    %c0_14 = arith.constant 0 : index
    %17 = vector.load %arg7[%c16, %c0_14] : memref<72x256xbf16, #tpu.memory_space<vmem>>, vector<8x256xbf16>
    tpu.vector_store %arg7[%c16, %c0_14], %16 {strides = array<i32>} : memref<72x256xbf16, #tpu.memory_space<vmem>>, vector<8x256xbf16>,
    %c0_15 = arith.constant 0 : index
    %c135 = arith.constant 135 : index
    %18 = vector.load %arg6[%c0_15, %c135] : memref<8x640xbf16, #tpu.memory_space<vmem>>, vector<8x256xbf16>
    %c0_16 = arith.constant 0 : index
    %c0_17 = arith.constant 0 : index
    %19 = vector.load %arg4[%c0_16, %c0_17] : memref<12x256xbf16, #tpu.memory_space<vmem>>, vector<1x256xbf16>
    %20 = vector.broadcast %19 : vector<1x256xbf16> to vector<8x256xbf16>
    %21 = arith.mulf %18, %20 : vector<8x256xbf16>
    %c24 = arith.constant 24 : index
    %c0_18 = arith.constant 0 : index
    %22 = vector.load %arg7[%c24, %c0_18] : memref<72x256xbf16, #tpu.memory_space<vmem>>, vector<8x256xbf16>
    tpu.vector_store %arg7[%c24, %c0_18], %21 {strides = array<i32>} : memref<72x256xbf16, #tpu.memory_space<vmem>>, vector<8x256xbf16>,
    %c0_19 = arith.constant 0 : index
    %c136_20 = arith.constant 136 : index
    %23 = vector.load %arg6[%c0_19, %c136_20] : memref<8x640xbf16, #tpu.memory_space<vmem>>, vector<8x256xbf16>
    %c32 = arith.constant 32 : index
    %c0_21 = arith.constant 0 : index
    %24 = vector.load %arg7[%c32, %c0_21] : memref<72x256xbf16, #tpu.memory_space<vmem>>, vector<8x256xbf16>
    tpu.vector_store %arg7[%c32, %c0_21], %23 {strides = array<i32>} : memref<72x256xbf16, #tpu.memory_space<vmem>>, vector<8x256xbf16>,
    %c0_22 = arith.constant 0 : index
    %c137 = arith.constant 137 : index
    %25 = vector.load %arg6[%c0_22, %c137] : memref<8x640xbf16, #tpu.memory_space<vmem>>, vector<8x256xbf16>
    %c2_23 = arith.constant 2 : index
    %c0_24 = arith.constant 0 : index
    %26 = vector.load %arg4[%c2_23, %c0_24] : memref<12x256xbf16, #tpu.memory_space<vmem>>, vector<1x256xbf16>
    %27 = vector.broadcast %26 : vector<1x256xbf16> to vector<8x256xbf16>
    %28 = arith.mulf %25, %27 : vector<8x256xbf16>
    %c40 = arith.constant 40 : index
    %c0_25 = arith.constant 0 : index
    %29 = vector.load %arg7[%c40, %c0_25] : memref<72x256xbf16, #tpu.memory_space<vmem>>, vector<8x256xbf16>
    tpu.vector_store %arg7[%c40, %c0_25], %28 {strides = array<i32>} : memref<72x256xbf16, #tpu.memory_space<vmem>>, vector<8x256xbf16>,
    %c0_26 = arith.constant 0 : index
    %c151 = arith.constant 151 : index
    %30 = vector.load %arg6[%c0_26, %c151] : memref<8x640xbf16, #tpu.memory_space<vmem>>, vector<8x256xbf16>
    %c0_27 = arith.constant 0 : index
    %c0_28 = arith.constant 0 : index
    %31 = vector.load %arg4[%c0_27, %c0_28] : memref<12x256xbf16, #tpu.memory_space<vmem>>, vector<1x256xbf16>
    %32 = vector.broadcast %31 : vector<1x256xbf16> to vector<8x256xbf16>
    %33 = arith.mulf %30, %32 : vector<8x256xbf16>
    %c48 = arith.constant 48 : index
    %c0_29 = arith.constant 0 : index
    %34 = vector.load %arg7[%c48, %c0_29] : memref<72x256xbf16, #tpu.memory_space<vmem>>, vector<8x256xbf16>
    tpu.vector_store %arg7[%c48, %c0_29], %33 {strides = array<i32>} : memref<72x256xbf16, #tpu.memory_space<vmem>>, vector<8x256xbf16>,
    %c0_30 = arith.constant 0 : index
    %c152 = arith.constant 152 : index
    %35 = vector.load %arg6[%c0_30, %c152] : memref<8x640xbf16, #tpu.memory_space<vmem>>, vector<8x256xbf16>
    %c56 = arith.constant 56 : index
    %c0_31 = arith.constant 0 : index
    %36 = vector.load %arg7[%c56, %c0_31] : memref<72x256xbf16, #tpu.memory_space<vmem>>, vector<8x256xbf16>
    tpu.vector_store %arg7[%c56, %c0_31], %35 {strides = array<i32>} : memref<72x256xbf16, #tpu.memory_space<vmem>>, vector<8x256xbf16>,
    %c0_32 = arith.constant 0 : index
    %c153 = arith.constant 153 : index
    %37 = vector.load %arg6[%c0_32, %c153] : memref<8x640xbf16, #tpu.memory_space<vmem>>, vector<8x256xbf16>
    %c2_33 = arith.constant 2 : index
    %c0_34 = arith.constant 0 : index
    %38 = vector.load %arg4[%c2_33, %c0_34] : memref<12x256xbf16, #tpu.memory_space<vmem>>, vector<1x256xbf16>
    %39 = vector.broadcast %38 : vector<1x256xbf16> to vector<8x256xbf16>
    %40 = arith.mulf %37, %39 : vector<8x256xbf16>
    %c64 = arith.constant 64 : index
    %c0_35 = arith.constant 0 : index
    %41 = vector.load %arg7[%c64, %c0_35] : memref<72x256xbf16, #tpu.memory_space<vmem>>, vector<8x256xbf16>
    tpu.vector_store %arg7[%c64, %c0_35], %40 {strides = array<i32>} : memref<72x256xbf16, #tpu.memory_space<vmem>>, vector<8x256xbf16>,
    %c0_36 = arith.constant 0 : index
    %c0_37 = arith.constant 0 : index
    %c0_38 = arith.constant 0 : index
    %42 = vector.load %arg2[%c0_36, %c0_37, %c0_38] : memref<4x2x72xbf16, #tpu.memory_space<vmem>>, vector<1x2x72xbf16>
    %43 = vector.shape_cast %42 : vector<1x2x72xbf16> to vector<2x72xbf16>
    %c0_39 = arith.constant 0 : index
    %c0_40 = arith.constant 0 : index
    %44 = vector.load %arg7[%c0_39, %c0_40] : memref<72x256xbf16, #tpu.memory_space<vmem>>, vector<72x256xbf16>
    %cst_41 = arith.constant dense<0.000000e+00> : vector<2x256xf32>
    %45 = tpu.matmul %43, %44, %cst_41 {dimension_numbers = #tpu.dot_dimension_numbers<[1], [0], [0], [1], [0, 0, 1, 1], [], []>} : vector<2x72xbf16>, vector<72x256xbf16>, vector<2x256xf32> -> vector<2x256xf32>
    %c0_42 = arith.constant 0 : index
    %c102 = arith.constant 102 : index
    %46 = vector.load %arg6[%c0_42, %c102] : memref<8x640xbf16, #tpu.memory_space<vmem>>, vector<8x256xbf16>
    %c3 = arith.constant 3 : index
    %c0_43 = arith.constant 0 : index
    %47 = vector.load %arg4[%c3, %c0_43] : memref<12x256xbf16, #tpu.memory_space<vmem>>, vector<1x256xbf16>
    %48 = vector.broadcast %47 : vector<1x256xbf16> to vector<8x256xbf16>
    %49 = arith.mulf %46, %48 : vector<8x256xbf16>
    %c0_44 = arith.constant 0 : index
    %c0_45 = arith.constant 0 : index
    %50 = vector.load %arg7[%c0_44, %c0_45] : memref<72x256xbf16, #tpu.memory_space<vmem>>, vector<8x256xbf16>
    tpu.vector_store %arg7[%c0_44, %c0_45], %49 {strides = array<i32>} : memref<72x256xbf16, #tpu.memory_space<vmem>>, vector<8x256xbf16>,
    %c0_46 = arith.constant 0 : index
    %c104 = arith.constant 104 : index
    %51 = vector.load %arg6[%c0_46, %c104] : memref<8x640xbf16, #tpu.memory_space<vmem>>, vector<8x256xbf16>
    %c8_47 = arith.constant 8 : index
    %c0_48 = arith.constant 0 : index
    %52 = vector.load %arg7[%c8_47, %c0_48] : memref<72x256xbf16, #tpu.memory_space<vmem>>, vector<8x256xbf16>
    tpu.vector_store %arg7[%c8_47, %c0_48], %51 {strides = array<i32>} : memref<72x256xbf16, #tpu.memory_space<vmem>>, vector<8x256xbf16>,
    %c0_49 = arith.constant 0 : index
    %c106 = arith.constant 106 : index
    %53 = vector.load %arg6[%c0_49, %c106] : memref<8x640xbf16, #tpu.memory_space<vmem>>, vector<8x256xbf16>
    %c5 = arith.constant 5 : index
    %c0_50 = arith.constant 0 : index
    %54 = vector.load %arg4[%c5, %c0_50] : memref<12x256xbf16, #tpu.memory_space<vmem>>, vector<1x256xbf16>
    %55 = vector.broadcast %54 : vector<1x256xbf16> to vector<8x256xbf16>
    %56 = arith.mulf %53, %55 : vector<8x256xbf16>
    %c16_51 = arith.constant 16 : index
    %c0_52 = arith.constant 0 : index
    %57 = vector.load %arg7[%c16_51, %c0_52] : memref<72x256xbf16, #tpu.memory_space<vmem>>, vector<8x256xbf16>
    tpu.vector_store %arg7[%c16_51, %c0_52], %56 {strides = array<i32>} : memref<72x256xbf16, #tpu.memory_space<vmem>>, vector<8x256xbf16>,
    %c0_53 = arith.constant 0 : index
    %c134 = arith.constant 134 : index
    %58 = vector.load %arg6[%c0_53, %c134] : memref<8x640xbf16, #tpu.memory_space<vmem>>, vector<8x256xbf16>
    %c3_54 = arith.constant 3 : index
    %c0_55 = arith.constant 0 : index
    %59 = vector.load %arg4[%c3_54, %c0_55] : memref<12x256xbf16, #tpu.memory_space<vmem>>, vector<1x256xbf16>
    %60 = vector.broadcast %59 : vector<1x256xbf16> to vector<8x256xbf16>
    %61 = arith.mulf %58, %60 : vector<8x256xbf16>
    %c24_56 = arith.constant 24 : index
    %c0_57 = arith.constant 0 : index
    %62 = vector.load %arg7[%c24_56, %c0_57] : memref<72x256xbf16, #tpu.memory_space<vmem>>, vector<8x256xbf16>
    tpu.vector_store %arg7[%c24_56, %c0_57], %61 {strides = array<i32>} : memref<72x256xbf16, #tpu.memory_space<vmem>>, vector<8x256xbf16>,
    %c0_58 = arith.constant 0 : index
    %c136_59 = arith.constant 136 : index
    %63 = vector.load %arg6[%c0_58, %c136_59] : memref<8x640xbf16, #tpu.memory_space<vmem>>, vector<8x256xbf16>
    %c32_60 = arith.constant 32 : index
    %c0_61 = arith.constant 0 : index
    %64 = vector.load %arg7[%c32_60, %c0_61] : memref<72x256xbf16, #tpu.memory_space<vmem>>, vector<8x256xbf16>
    tpu.vector_store %arg7[%c32_60, %c0_61], %63 {strides = array<i32>} : memref<72x256xbf16, #tpu.memory_space<vmem>>, vector<8x256xbf16>,
    %c0_62 = arith.constant 0 : index
    %c138 = arith.constant 138 : index
    %65 = vector.load %arg6[%c0_62, %c138] : memref<8x640xbf16, #tpu.memory_space<vmem>>, vector<8x256xbf16>
    %c5_63 = arith.constant 5 : index
    %c0_64 = arith.constant 0 : index
    %66 = vector.load %arg4[%c5_63, %c0_64] : memref<12x256xbf16, #tpu.memory_space<vmem>>, vector<1x256xbf16>
    %67 = vector.broadcast %66 : vector<1x256xbf16> to vector<8x256xbf16>
    %68 = arith.mulf %65, %67 : vector<8x256xbf16>
    %c40_65 = arith.constant 40 : index
    %c0_66 = arith.constant 0 : index
    %69 = vector.load %arg7[%c40_65, %c0_66] : memref<72x256xbf16, #tpu.memory_space<vmem>>, vector<8x256xbf16>
    tpu.vector_store %arg7[%c40_65, %c0_66], %68 {strides = array<i32>} : memref<72x256xbf16, #tpu.memory_space<vmem>>, vector<8x256xbf16>,
    %c0_67 = arith.constant 0 : index
    %c166 = arith.constant 166 : index
    %70 = vector.load %arg6[%c0_67, %c166] : memref<8x640xbf16, #tpu.memory_space<vmem>>, vector<8x256xbf16>
    %c3_68 = arith.constant 3 : index
    %c0_69 = arith.constant 0 : index
    %71 = vector.load %arg4[%c3_68, %c0_69] : memref<12x256xbf16, #tpu.memory_space<vmem>>, vector<1x256xbf16>
    %72 = vector.broadcast %71 : vector<1x256xbf16> to vector<8x256xbf16>
    %73 = arith.mulf %70, %72 : vector<8x256xbf16>
    %c48_70 = arith.constant 48 : index
    %c0_71 = arith.constant 0 : index
    %74 = vector.load %arg7[%c48_70, %c0_71] : memref<72x256xbf16, #tpu.memory_space<vmem>>, vector<8x256xbf16>
    tpu.vector_store %arg7[%c48_70, %c0_71], %73 {strides = array<i32>} : memref<72x256xbf16, #tpu.memory_space<vmem>>, vector<8x256xbf16>,
    %c0_72 = arith.constant 0 : index
    %c168 = arith.constant 168 : index
    %75 = vector.load %arg6[%c0_72, %c168] : memref<8x640xbf16, #tpu.memory_space<vmem>>, vector<8x256xbf16>
    %c56_73 = arith.constant 56 : index
    %c0_74 = arith.constant 0 : index
    %76 = vector.load %arg7[%c56_73, %c0_74] : memref<72x256xbf16, #tpu.memory_space<vmem>>, vector<8x256xbf16>
    tpu.vector_store %arg7[%c56_73, %c0_74], %75 {strides = array<i32>} : memref<72x256xbf16, #tpu.memory_space<vmem>>, vector<8x256xbf16>,
    %c0_75 = arith.constant 0 : index
    %c170 = arith.constant 170 : index
    %77 = vector.load %arg6[%c0_75, %c170] : memref<8x640xbf16, #tpu.memory_space<vmem>>, vector<8x256xbf16>
    %c5_76 = arith.constant 5 : index
    %c0_77 = arith.constant 0 : index
    %78 = vector.load %arg4[%c5_76, %c0_77] : memref<12x256xbf16, #tpu.memory_space<vmem>>, vector<1x256xbf16>
    %79 = vector.broadcast %78 : vector<1x256xbf16> to vector<8x256xbf16>
    %80 = arith.mulf %77, %79 : vector<8x256xbf16>
    %c64_78 = arith.constant 64 : index
    %c0_79 = arith.constant 0 : index
    %81 = vector.load %arg7[%c64_78, %c0_79] : memref<72x256xbf16, #tpu.memory_space<vmem>>, vector<8x256xbf16>
    tpu.vector_store %arg7[%c64_78, %c0_79], %80 {strides = array<i32>} : memref<72x256xbf16, #tpu.memory_space<vmem>>, vector<8x256xbf16>,
    %c1 = arith.constant 1 : index
    %c0_80 = arith.constant 0 : index
    %c0_81 = arith.constant 0 : index
    %82 = vector.load %arg2[%c1, %c0_80, %c0_81] : memref<4x2x72xbf16, #tpu.memory_space<vmem>>, vector<1x2x72xbf16>
    %83 = vector.shape_cast %82 : vector<1x2x72xbf16> to vector<2x72xbf16>
    %c0_82 = arith.constant 0 : index
    %c0_83 = arith.constant 0 : index
    %84 = vector.load %arg7[%c0_82, %c0_83] : memref<72x256xbf16, #tpu.memory_space<vmem>>, vector<72x256xbf16>
    %cst_84 = arith.constant dense<0.000000e+00> : vector<2x256xf32>
    %85 = tpu.matmul %83, %84, %cst_84 {dimension_numbers = #tpu.dot_dimension_numbers<[1], [0], [0], [1], [0, 0, 1, 1], [], []>} : vector<2x72xbf16>, vector<72x256xbf16>, vector<2x256xf32> -> vector<2x256xf32>
    %c0_85 = arith.constant 0 : index
    %c68 = arith.constant 68 : index
    %86 = vector.load %arg6[%c0_85, %c68] : memref<8x640xbf16, #tpu.memory_space<vmem>>, vector<8x256xbf16>
    %c6 = arith.constant 6 : index
    %c0_86 = arith.constant 0 : index
    %87 = vector.load %arg4[%c6, %c0_86] : memref<12x256xbf16, #tpu.memory_space<vmem>>, vector<1x256xbf16>
    %88 = vector.broadcast %87 : vector<1x256xbf16> to vector<8x256xbf16>
    %89 = arith.mulf %86, %88 : vector<8x256xbf16>
    %c0_87 = arith.constant 0 : index
    %c0_88 = arith.constant 0 : index
    %90 = vector.load %arg7[%c0_87, %c0_88] : memref<72x256xbf16, #tpu.memory_space<vmem>>, vector<8x256xbf16>
    tpu.vector_store %arg7[%c0_87, %c0_88], %89 {strides = array<i32>} : memref<72x256xbf16, #tpu.memory_space<vmem>>, vector<8x256xbf16>,
    %c0_89 = arith.constant 0 : index
    %c72 = arith.constant 72 : index
    %91 = vector.load %arg6[%c0_89, %c72] : memref<8x640xbf16, #tpu.memory_space<vmem>>, vector<8x256xbf16>
    %c8_90 = arith.constant 8 : index
    %c0_91 = arith.constant 0 : index
    %92 = vector.load %arg7[%c8_90, %c0_91] : memref<72x256xbf16, #tpu.memory_space<vmem>>, vector<8x256xbf16>
    tpu.vector_store %arg7[%c8_90, %c0_91], %91 {strides = array<i32>} : memref<72x256xbf16, #tpu.memory_space<vmem>>, vector<8x256xbf16>,
    %c0_92 = arith.constant 0 : index
    %c76 = arith.constant 76 : index
    %93 = vector.load %arg6[%c0_92, %c76] : memref<8x640xbf16, #tpu.memory_space<vmem>>, vector<8x256xbf16>
    %c8_93 = arith.constant 8 : index
    %c0_94 = arith.constant 0 : index
    %94 = vector.load %arg4[%c8_93, %c0_94] : memref<12x256xbf16, #tpu.memory_space<vmem>>, vector<1x256xbf16>
    %95 = vector.broadcast %94 : vector<1x256xbf16> to vector<8x256xbf16>
    %96 = arith.mulf %93, %95 : vector<8x256xbf16>
    %c16_95 = arith.constant 16 : index
    %c0_96 = arith.constant 0 : index
    %97 = vector.load %arg7[%c16_95, %c0_96] : memref<72x256xbf16, #tpu.memory_space<vmem>>, vector<8x256xbf16>
    tpu.vector_store %arg7[%c16_95, %c0_96], %96 {strides = array<i32>} : memref<72x256xbf16, #tpu.memory_space<vmem>>, vector<8x256xbf16>,
    %c0_97 = arith.constant 0 : index
    %c132 = arith.constant 132 : index
    %98 = vector.load %arg6[%c0_97, %c132] : memref<8x640xbf16, #tpu.memory_space<vmem>>, vector<8x256xbf16>
    %c6_98 = arith.constant 6 : index
    %c0_99 = arith.constant 0 : index
    %99 = vector.load %arg4[%c6_98, %c0_99] : memref<12x256xbf16, #tpu.memory_space<vmem>>, vector<1x256xbf16>
    %100 = vector.broadcast %99 : vector<1x256xbf16> to vector<8x256xbf16>
    %101 = arith.mulf %98, %100 : vector<8x256xbf16>
    %c24_100 = arith.constant 24 : index
    %c0_101 = arith.constant 0 : index
    %102 = vector.load %arg7[%c24_100, %c0_101] : memref<72x256xbf16, #tpu.memory_space<vmem>>, vector<8x256xbf16>
    tpu.vector_store %arg7[%c24_100, %c0_101], %101 {strides = array<i32>} : memref<72x256xbf16, #tpu.memory_space<vmem>>, vector<8x256xbf16>,
    %c0_102 = arith.constant 0 : index
    %c136_103 = arith.constant 136 : index
    %103 = vector.load %arg6[%c0_102, %c136_103] : memref<8x640xbf16, #tpu.memory_space<vmem>>, vector<8x256xbf16>
    %c32_104 = arith.constant 32 : index
    %c0_105 = arith.constant 0 : index
    %104 = vector.load %arg7[%c32_104, %c0_105] : memref<72x256xbf16, #tpu.memory_space<vmem>>, vector<8x256xbf16>
    tpu.vector_store %arg7[%c32_104, %c0_105], %103 {strides = array<i32>} : memref<72x256xbf16, #tpu.memory_space<vmem>>, vector<8x256xbf16>,
    %c0_106 = arith.constant 0 : index
    %c140 = arith.constant 140 : index
    %105 = vector.load %arg6[%c0_106, %c140] : memref<8x640xbf16, #tpu.memory_space<vmem>>, vector<8x256xbf16>
    %c8_107 = arith.constant 8 : index
    %c0_108 = arith.constant 0 : index
    %106 = vector.load %arg4[%c8_107, %c0_108] : memref<12x256xbf16, #tpu.memory_space<vmem>>, vector<1x256xbf16>
    %107 = vector.broadcast %106 : vector<1x256xbf16> to vector<8x256xbf16>
    %108 = arith.mulf %105, %107 : vector<8x256xbf16>
    %c40_109 = arith.constant 40 : index
    %c0_110 = arith.constant 0 : index
    %109 = vector.load %arg7[%c40_109, %c0_110] : memref<72x256xbf16, #tpu.memory_space<vmem>>, vector<8x256xbf16>
    tpu.vector_store %arg7[%c40_109, %c0_110], %108 {strides = array<i32>} : memref<72x256xbf16, #tpu.memory_space<vmem>>, vector<8x256xbf16>,
    %c0_111 = arith.constant 0 : index
    %c196 = arith.constant 196 : index
    %110 = vector.load %arg6[%c0_111, %c196] : memref<8x640xbf16, #tpu.memory_space<vmem>>, vector<8x256xbf16>
    %c6_112 = arith.constant 6 : index
    %c0_113 = arith.constant 0 : index
    %111 = vector.load %arg4[%c6_112, %c0_113] : memref<12x256xbf16, #tpu.memory_space<vmem>>, vector<1x256xbf16>
    %112 = vector.broadcast %111 : vector<1x256xbf16> to vector<8x256xbf16>
    %113 = arith.mulf %110, %112 : vector<8x256xbf16>
    %c48_114 = arith.constant 48 : index
    %c0_115 = arith.constant 0 : index
    %114 = vector.load %arg7[%c48_114, %c0_115] : memref<72x256xbf16, #tpu.memory_space<vmem>>, vector<8x256xbf16>
    tpu.vector_store %arg7[%c48_114, %c0_115], %113 {strides = array<i32>} : memref<72x256xbf16, #tpu.memory_space<vmem>>, vector<8x256xbf16>,
    %c0_116 = arith.constant 0 : index
    %c200 = arith.constant 200 : index
    %115 = vector.load %arg6[%c0_116, %c200] : memref<8x640xbf16, #tpu.memory_space<vmem>>, vector<8x256xbf16>
    %c56_117 = arith.constant 56 : index
    %c0_118 = arith.constant 0 : index
    %116 = vector.load %arg7[%c56_117, %c0_118] : memref<72x256xbf16, #tpu.memory_space<vmem>>, vector<8x256xbf16>
    tpu.vector_store %arg7[%c56_117, %c0_118], %115 {strides = array<i32>} : memref<72x256xbf16, #tpu.memory_space<vmem>>, vector<8x256xbf16>,
    %c0_119 = arith.constant 0 : index
    %c204 = arith.constant 204 : index
    %117 = vector.load %arg6[%c0_119, %c204] : memref<8x640xbf16, #tpu.memory_space<vmem>>, vector<8x256xbf16>
    %c8_120 = arith.constant 8 : index
    %c0_121 = arith.constant 0 : index
    %118 = vector.load %arg4[%c8_120, %c0_121] : memref<12x256xbf16, #tpu.memory_space<vmem>>, vector<1x256xbf16>
    %119 = vector.broadcast %118 : vector<1x256xbf16> to vector<8x256xbf16>
    %120 = arith.mulf %117, %119 : vector<8x256xbf16>
    %c64_122 = arith.constant 64 : index
    %c0_123 = arith.constant 0 : index
    %121 = vector.load %arg7[%c64_122, %c0_123] : memref<72x256xbf16, #tpu.memory_space<vmem>>, vector<8x256xbf16>
    tpu.vector_store %arg7[%c64_122, %c0_123], %120 {strides = array<i32>} : memref<72x256xbf16, #tpu.memory_space<vmem>>, vector<8x256xbf16>,
    %c2_124 = arith.constant 2 : index
    %c0_125 = arith.constant 0 : index
    %c0_126 = arith.constant 0 : index
    %122 = vector.load %arg2[%c2_124, %c0_125, %c0_126] : memref<4x2x72xbf16, #tpu.memory_space<vmem>>, vector<1x2x72xbf16>
    %123 = vector.shape_cast %122 : vector<1x2x72xbf16> to vector<2x72xbf16>
    %c0_127 = arith.constant 0 : index
    %c0_128 = arith.constant 0 : index
    %124 = vector.load %arg7[%c0_127, %c0_128] : memref<72x256xbf16, #tpu.memory_space<vmem>>, vector<72x256xbf16>
    %cst_129 = arith.constant dense<0.000000e+00> : vector<2x256xf32>
    %125 = tpu.matmul %123, %124, %cst_129 {dimension_numbers = #tpu.dot_dimension_numbers<[1], [0], [0], [1], [0, 0, 1, 1], [], []>} : vector<2x72xbf16>, vector<72x256xbf16>, vector<2x256xf32> -> vector<2x256xf32>
    %c0_130 = arith.constant 0 : index
    %c0_131 = arith.constant 0 : index
    %126 = vector.load %arg6[%c0_130, %c0_131] : memref<8x640xbf16, #tpu.memory_space<vmem>>, vector<8x256xbf16>
    %c9 = arith.constant 9 : index
    %c0_132 = arith.constant 0 : index
    %127 = vector.load %arg4[%c9, %c0_132] : memref<12x256xbf16, #tpu.memory_space<vmem>>, vector<1x256xbf16>
    %128 = vector.broadcast %127 : vector<1x256xbf16> to vector<8x256xbf16>
    %129 = arith.mulf %126, %128 : vector<8x256xbf16>
    %c0_133 = arith.constant 0 : index
    %c0_134 = arith.constant 0 : index
    %130 = vector.load %arg7[%c0_133, %c0_134] : memref<72x256xbf16, #tpu.memory_space<vmem>>, vector<8x256xbf16>
    tpu.vector_store %arg7[%c0_133, %c0_134], %129 {strides = array<i32>} : memref<72x256xbf16, #tpu.memory_space<vmem>>, vector<8x256xbf16>,
    %c0_135 = arith.constant 0 : index
    %c8_136 = arith.constant 8 : index
    %131 = vector.load %arg6[%c0_135, %c8_136] : memref<8x640xbf16, #tpu.memory_space<vmem>>, vector<8x256xbf16>
    %c8_137 = arith.constant 8 : index
    %c0_138 = arith.constant 0 : index
    %132 = vector.load %arg7[%c8_137, %c0_138] : memref<72x256xbf16, #tpu.memory_space<vmem>>, vector<8x256xbf16>
    tpu.vector_store %arg7[%c8_137, %c0_138], %131 {strides = array<i32>} : memref<72x256xbf16, #tpu.memory_space<vmem>>, vector<8x256xbf16>,
    %c0_139 = arith.constant 0 : index
    %c16_140 = arith.constant 16 : index
    %133 = vector.load %arg6[%c0_139, %c16_140] : memref<8x640xbf16, #tpu.memory_space<vmem>>, vector<8x256xbf16>
    %c11 = arith.constant 11 : index
    %c0_141 = arith.constant 0 : index
    %134 = vector.load %arg4[%c11, %c0_141] : memref<12x256xbf16, #tpu.memory_space<vmem>>, vector<1x256xbf16>
    %135 = vector.broadcast %134 : vector<1x256xbf16> to vector<8x256xbf16>
    %136 = arith.mulf %133, %135 : vector<8x256xbf16>
    %c16_142 = arith.constant 16 : index
    %c0_143 = arith.constant 0 : index
    %137 = vector.load %arg7[%c16_142, %c0_143] : memref<72x256xbf16, #tpu.memory_space<vmem>>, vector<8x256xbf16>
    tpu.vector_store %arg7[%c16_142, %c0_143], %136 {strides = array<i32>} : memref<72x256xbf16, #tpu.memory_space<vmem>>, vector<8x256xbf16>,
    %c0_144 = arith.constant 0 : index
    %c128 = arith.constant 128 : index
    %138 = vector.load %arg6[%c0_144, %c128] : memref<8x640xbf16, #tpu.memory_space<vmem>>, vector<8x256xbf16>
    %c9_145 = arith.constant 9 : index
    %c0_146 = arith.constant 0 : index
    %139 = vector.load %arg4[%c9_145, %c0_146] : memref<12x256xbf16, #tpu.memory_space<vmem>>, vector<1x256xbf16>
    %140 = vector.broadcast %139 : vector<1x256xbf16> to vector<8x256xbf16>
    %141 = arith.mulf %138, %140 : vector<8x256xbf16>
    %c24_147 = arith.constant 24 : index
    %c0_148 = arith.constant 0 : index
    %142 = vector.load %arg7[%c24_147, %c0_148] : memref<72x256xbf16, #tpu.memory_space<vmem>>, vector<8x256xbf16>
    tpu.vector_store %arg7[%c24_147, %c0_148], %141 {strides = array<i32>} : memref<72x256xbf16, #tpu.memory_space<vmem>>, vector<8x256xbf16>,
    %c0_149 = arith.constant 0 : index
    %c136_150 = arith.constant 136 : index
    %143 = vector.load %arg6[%c0_149, %c136_150] : memref<8x640xbf16, #tpu.memory_space<vmem>>, vector<8x256xbf16>
    %c32_151 = arith.constant 32 : index
    %c0_152 = arith.constant 0 : index
    %144 = vector.load %arg7[%c32_151, %c0_152] : memref<72x256xbf16, #tpu.memory_space<vmem>>, vector<8x256xbf16>
    tpu.vector_store %arg7[%c32_151, %c0_152], %143 {strides = array<i32>} : memref<72x256xbf16, #tpu.memory_space<vmem>>, vector<8x256xbf16>,
    %c0_153 = arith.constant 0 : index
    %c144 = arith.constant 144 : index
    %145 = vector.load %arg6[%c0_153, %c144] : memref<8x640xbf16, #tpu.memory_space<vmem>>, vector<8x256xbf16>
    %c11_154 = arith.constant 11 : index
    %c0_155 = arith.constant 0 : index
    %146 = vector.load %arg4[%c11_154, %c0_155] : memref<12x256xbf16, #tpu.memory_space<vmem>>, vector<1x256xbf16>
    %147 = vector.broadcast %146 : vector<1x256xbf16> to vector<8x256xbf16>
    %148 = arith.mulf %145, %147 : vector<8x256xbf16>
    %c40_156 = arith.constant 40 : index
    %c0_157 = arith.constant 0 : index
    %149 = vector.load %arg7[%c40_156, %c0_157] : memref<72x256xbf16, #tpu.memory_space<vmem>>, vector<8x256xbf16>
    tpu.vector_store %arg7[%c40_156, %c0_157], %148 {strides = array<i32>} : memref<72x256xbf16, #tpu.memory_space<vmem>>, vector<8x256xbf16>,
    %c0_158 = arith.constant 0 : index
    %c256 = arith.constant 256 : index
    %150 = vector.load %arg6[%c0_158, %c256] : memref<8x640xbf16, #tpu.memory_space<vmem>>, vector<8x256xbf16>
    %c9_159 = arith.constant 9 : index
    %c0_160 = arith.constant 0 : index
    %151 = vector.load %arg4[%c9_159, %c0_160] : memref<12x256xbf16, #tpu.memory_space<vmem>>, vector<1x256xbf16>
    %152 = vector.broadcast %151 : vector<1x256xbf16> to vector<8x256xbf16>
    %153 = arith.mulf %150, %152 : vector<8x256xbf16>
    %c48_161 = arith.constant 48 : index
    %c0_162 = arith.constant 0 : index
    %154 = vector.load %arg7[%c48_161, %c0_162] : memref<72x256xbf16, #tpu.memory_space<vmem>>, vector<8x256xbf16>
    tpu.vector_store %arg7[%c48_161, %c0_162], %153 {strides = array<i32>} : memref<72x256xbf16, #tpu.memory_space<vmem>>, vector<8x256xbf16>,
    %c0_163 = arith.constant 0 : index
    %c264 = arith.constant 264 : index
    %155 = vector.load %arg6[%c0_163, %c264] : memref<8x640xbf16, #tpu.memory_space<vmem>>, vector<8x256xbf16>
    %c56_164 = arith.constant 56 : index
    %c0_165 = arith.constant 0 : index
    %156 = vector.load %arg7[%c56_164, %c0_165] : memref<72x256xbf16, #tpu.memory_space<vmem>>, vector<8x256xbf16>
    tpu.vector_store %arg7[%c56_164, %c0_165], %155 {strides = array<i32>} : memref<72x256xbf16, #tpu.memory_space<vmem>>, vector<8x256xbf16>,
    %c0_166 = arith.constant 0 : index
    %c272 = arith.constant 272 : index
    %157 = vector.load %arg6[%c0_166, %c272] : memref<8x640xbf16, #tpu.memory_space<vmem>>, vector<8x256xbf16>
    %c11_167 = arith.constant 11 : index
    %c0_168 = arith.constant 0 : index
    %158 = vector.load %arg4[%c11_167, %c0_168] : memref<12x256xbf16, #tpu.memory_space<vmem>>, vector<1x256xbf16>
    %159 = vector.broadcast %158 : vector<1x256xbf16> to vector<8x256xbf16>
    %160 = arith.mulf %157, %159 : vector<8x256xbf16>
    %c64_169 = arith.constant 64 : index
    %c0_170 = arith.constant 0 : index
    %161 = vector.load %arg7[%c64_169, %c0_170] : memref<72x256xbf16, #tpu.memory_space<vmem>>, vector<8x256xbf16>
    tpu.vector_store %arg7[%c64_169, %c0_170], %160 {strides = array<i32>} : memref<72x256xbf16, #tpu.memory_space<vmem>>, vector<8x256xbf16>,
    %c3_171 = arith.constant 3 : index
    %c0_172 = arith.constant 0 : index
    %c0_173 = arith.constant 0 : index
    %162 = vector.load %arg2[%c3_171, %c0_172, %c0_173] : memref<4x2x72xbf16, #tpu.memory_space<vmem>>, vector<1x2x72xbf16>
    %163 = vector.shape_cast %162 : vector<1x2x72xbf16> to vector<2x72xbf16>
    %c0_174 = arith.constant 0 : index
    %c0_175 = arith.constant 0 : index
    %164 = vector.load %arg7[%c0_174, %c0_175] : memref<72x256xbf16, #tpu.memory_space<vmem>>, vector<72x256xbf16>
    %cst_176 = arith.constant dense<0.000000e+00> : vector<2x256xf32>
    %165 = tpu.matmul %163, %164, %cst_176 {dimension_numbers = #tpu.dot_dimension_numbers<[1], [0], [0], [1], [0, 0, 1, 1], [], []>} : vector<2x72xbf16>, vector<72x256xbf16>, vector<2x256xf32> -> vector<2x256xf32>
    %166 = tpu.concatenate %45, %85, %125, %165 in 0 : vector<2x256xf32>, vector<2x256xf32>, vector<2x256xf32>, vector<2x256xf32> -> vector<8x256xf32>
    %c0_177 = arith.constant 0 : index
    %c0_178 = arith.constant 0 : index
    %167 = vector.load %arg3[%c0_177, %c0_178] : memref<8x1xf32, #tpu.memory_space<vmem>>, vector<8x1xf32>
    %168 = vector.broadcast %167 : vector<8x1xf32> to vector<8x256xf32>
    %169 = arith.addf %166, %168 : vector<8x256xf32>
    %c0_179 = arith.constant 0 : index
    %c0_180 = arith.constant 0 : index
    %c0_181 = arith.constant 0 : index
    %170 = vector.load %arg5[%c0_179, %c0_180, %c0_181] : memref<1x8x256xf32, #tpu.memory_space<vmem>>, vector<1x8x256xf32>
    %171 = vector.shape_cast %170 : vector<1x8x256xf32> to vector<8x256xf32>
    %172 = vector.shape_cast %169 : vector<8x256xf32> to vector<1x8x256xf32>
    tpu.vector_store %arg5[%c0_179, %c0_180, %c0_181], %172 {strides = array<i32>} : memref<1x8x256xf32, #tpu.memory_space<vmem>>, vector<1x8x256xf32>,
    return
  }
  func.func @transform_0(%arg0: i32) -> (i32, i32, i32) {
    %c0_i32 = arith.constant 0 : i32
    %c0_i32_0 = arith.constant 0 : i32
    %c0_i32_1 = arith.constant 0 : i32
    return %arg0, %c0_i32, %c0_i32_0 : i32, i32, i32
  }
  func.func @transform_1(%arg0: i32) -> (i32, i32, i32) {
    %c0_i32 = arith.constant 0 : i32
    %c0_i32_0 = arith.constant 0 : i32
    %c0_i32_1 = arith.constant 0 : i32
    %c0_i32_2 = arith.constant 0 : i32
    return %c0_i32, %c0_i32_0, %c0_i32_1 : i32, i32, i32
  }
  func.func @transform_2(%arg0: i32) -> (i32, i32) {
    %c0_i32 = arith.constant 0 : i32
    %c0_i32_0 = arith.constant 0 : i32
    %c0_i32_1 = arith.constant 0 : i32
    return %c0_i32, %c0_i32_0 : i32, i32
  }
  func.func @transform_3(%arg0: i32) -> (i32, i32) {
    %c0_i32 = arith.constant 0 : i32
    %c0_i32_0 = arith.constant 0 : i32
    %c0_i32_1 = arith.constant 0 : i32
    return %c0_i32, %c0_i32_0 : i32, i32
  }
  func.func @transform_4(%arg0: i32) -> (i32, i32, i32) {
    %c0_i32 = arith.constant 0 : i32
    %c0_i32_0 = arith.constant 0 : i32
    %c0_i32_1 = arith.constant 0 : i32
    return %arg0, %c0_i32, %c0_i32_0 : i32, i32, i32
  }
}

</mosaic_0001>

<bundles_post_ra>
// kernel: tpu_custom_call.1
= control target key start
LH: loop header
LB: loop body
LE: loop exit
PB: predicated region body
PF: predicated region fallthrough
CT: control target
= control target key end

     0   :  { %9 = vsyncpa [#allocation5], 0  ;;  %s3107_s0 = inlined_call_operand.hbm [shape: f32[2,8,256], index: 0, kind: input, shape index: {}]   ;;  %s3108_s1 = inlined_call_operand.vmem [shape: bf16[4,2,72], index: 1, kind: input, shape index: {}]   ;;  %s3109_s2 = inlined_call_operand.vmem [shape: f32[8,1], index: 2, kind: input, shape index: {}]   ;;  %s3110_s3 = inlined_call_operand.hbm [shape: bf16[12,256], index: 3, kind: input, shape index: {}]   ;;  %s3111_s4 = inlined_call_operand.hbm [shape: f32[2,8,256], index: 4, kind: output, shape index: {}]  }
   0x1   :  { %11 = vsyncpa [#allocation5 + $0x1], 0 }
   0x2   :  { %12 = vsyncpa [#allocation8], 0 }
   0x3   :  { %13 = vsyncpa [#allocation6], 0 }
   0x4   :  { %15 = vsyncpa [#allocation6 + $0x1], 0  ;;  %s2592_s15 = smov 0   ;;  %s2594_s16 = smov 0  }
   0x5   :  { %s2596_s17 = smov 0   ;;  %s2598_s18 = smov 0  }
   0x6 LB: > { %s2613_s19 = sadd.s32 4294967295, %s2523_s18   ;;  %s2113_s20 = sadd.s32 4294967294, %s2523_s18   ;;  %s2523_s18 = sphi %s2598_s18, %s3133_s18   ;;  %s2519_s17 = sphi %s2596_s17, %s3132_s17   ;;  %s2515_s16 = sphi %s2594_s16, %s3131_s16   ;;  %s2511_s15 = sphi %s2592_s15, %s3130_s15  }
   0x7   : > { %p41_p0 = scmp.ne.s32.totalorder %s2515_s16, %s2511_s15  ;;  %p3112_p1 = scmp.eq.s32.totalorder %s2613_s19, 0 }
   0x8   : > { %p134_p3 = scmp.eq.s32.totalorder %s2113_s20, 1  ;;  %p2114_p5 = scmp.ge.s32.totalorder %s2523_s18, 1 }
   0x9   : > { %p2622_p4 = por %p3112_p1, %p41_p0  ;;  %p141_p7 = scmp.lt.s32.totalorder %s2523_s18, 3 }
   0xa   : > { %p2627_p6 = por %p134_p3, %p41_p0  ;;  %s2525_s24 = smov [#allocation7]  }
   0xb   : > { %s3116_s21 = scalar_select %p2622_p4, 1, 0 }
   0xc   : > { %s3117_s22 = scalar_select %p2627_p6, 1, 0 }
   0xd   : > { %p2632_p8 = pnand %p2114_p5, %p141_p7  ;;  %s159_s25 = sshll.u32 %s2525_s24, 4  ;;  %s160_s25 = int_to_ptr.vmem [resolvable:$true] %s159_s25 }
   0xe   : > { %s2646_s27 = sadd.s32 1, %s2523_s18   ;;  %s28_s28 = sadd.s32 1, %s2519_s17 }
   0xf   : > { %s3118_s23 = scalar_select %p2632_p8, 1, 0 }
  0x10   : > { %p2264_p9 = pneg %p2632_p8  ;;  %s25_s29 = ssub.s32 %s2523_s18, %s2646_s27 }
  0x11   : > { %s2412_s30 = scalar_lea.vmem %s160_s25, 256  ;;  %p2420_p5 = scmp.lt.s32.totalorder %s160_s25, %s160_s25 }
  0x12   : > { %p2641_p11 = pnand %p2264_p9, %p3112_p1  ;;  %p2413_p13 = scmp.ne.s32.totalorder %s160_s25, %s2412_s30 }
  0x13   : > { %p2421_p7 = scmp.lt.s32.totalorder %s2412_s30, %s2412_s30 }
  0x14   : > { %p2403_p12 = pneg %p2641_p11 }
  0x15   : > { %p2422_p10 = por %p2421_p7, %p2420_p5 }
  0x16   : > { %p2415_p0 = pnand %p2413_p13, %p2403_p12 }
  0x18   : > { %p2416_p3 = pneg %p2415_p0 }
  0x1a   : > { %p2423_p2 = pnand %p2422_p10, %p2416_p3 }
  0x1c   : > { %2426 = shalt.err (!%p2423_p2)
}
  0x1d   : > { %s2526_s5 = smov 128   ;;  %s2527_s6 = smov 8  }
  0x1e   : > { %2267 = dma.hbm_to_vmem [thread:$0]  (!%p2641_p11), %s3110_s3, 256, %s160_s25, [#allocation8], %s2526_s5, %s2526_s5, %s2527_s6  }
  0x1f   : > { %p26_p9 = scmp.eq.s32.totalorder %s25_s29, 0  ;;  %p35_p12 = scmp.ne.s32.totalorder %s2519_s17, %s2515_s16 }
  0x20   : > { %p36_p10 = scmp.eq.s32.totalorder %s2523_s18, 0  ;;  %p2277_p2 = scmp.lt.s32.totalorder %s2523_s18, 2 }
  0x21   : > { %s2663_s9 = scalar_select %p26_p9, %s2519_s17, %s28_s28  }
  0x22   : > { %p37_p13 = por %p36_p10, %p35_p12  ;;  %p3120_p0 = scmp.eq.s32.totalorder %s2613_s19, 1 }
  0x23   : > { %s173_s11 = sand.u32 1, %s2519_s17   ;;  %s2253_s12 = sshll.u32 %s2523_s18, 8 }
  0x24   : > { %p2667_p3 = por %p3120_p0, %p35_p12  ;;  %s2117_s13 = sshll.u32 %s173_s11, 4 }
  0x25   : > { %s2676_s24 = scalar_lea.hbm %s3107_s0, %s2253_s12  ;;  %s177_s25 = scalar_lea.vmem [#allocation4], %s2117_s13 }
  0x26   : > { %s3121_s10 = scalar_select %p2667_p3, 1, 0 }
  0x27   : > { %s185_s26 = sshll.u32 %s177_s25, 4  ;;  %p2678_p11 = pnand %p2277_p2, %p37_p13  ;;  %s186_s26 = int_to_ptr.vmem [resolvable:$true] %s185_s26 }
  0x28   : > { %s174_s29 = scalar_lea.sflag [#allocation5], %s173_s11  ;;  %s2427_s30 = scalar_lea.hbm %s2676_s24, 256 }
  0x29   : > { %p2428_p5 = scmp.ne.s32.totalorder %s2676_s24, %s2427_s30  ;;  %p2429_p7 = pneg %p2678_p11 }
  0x2a   : > { %s2432_s7 = scalar_lea.hbm %s3107_s0, 512  ;;  %p2433_p10 = scmp.lt.s32.totalorder %s2676_s24, %s3107_s0 }
  0x2b   : > { %p2430_p9 = pnand %p2429_p7, %p2428_p5  ;;  %p2434_p2 = scmp.lt.s32.totalorder %s2432_s7, %s2427_s30 }
  0x2d   : > { %p2431_p12 = pneg %p2430_p9  ;;  %p2435_p13 = por %p2434_p2, %p2433_p10 }
  0x2f   : > { %p2436_p0 = pnand %p2435_p13, %p2431_p12 }
  0x31   : > { %2439 = shalt.err (!%p2436_p0)
}
  0x32   : > { %s2440_s13 = scalar_lea.vmem %s186_s26, 256  ;;  %s2528_s11 = smov [#allocation4]  }
  0x33   : > { %p2441_p1 = scmp.ne.s32.totalorder %s186_s26, %s2440_s13  ;;  %s2445_s14 = sshll.u32 %s2528_s11, 4  ;;  %s2446_s14 = int_to_ptr.vmem [resolvable:$false] %s2445_s14 }
  0x34   : > { %s2447_s20 = scalar_lea.vmem %s2446_s14, 512  ;;  %p2448_p5 = scmp.lt.s32.totalorder %s186_s26, %s2446_s14 }
  0x35   : > { %p2443_p6 = pnand %p2441_p1, %p2429_p7  ;;  %p2449_p9 = scmp.lt.s32.totalorder %s2447_s20, %s2440_s13 }
  0x37   : > { %p2444_p3 = pneg %p2443_p6  ;;  %p2450_p4 = por %p2449_p9, %p2448_p5 }
  0x39   : > { %p2451_p8 = pnand %p2450_p4, %p2444_p3 }
  0x3b   : > { %2454 = shalt.err (!%p2451_p8)
}
  0x3c   : > { %2271 = dma.hbm_to_vmem [thread:$0]  (!%p2678_p11), %s2676_s24, 256, %s186_s26, %s174_s29  }
  0x3d   : > { %p3123_p12 = scmp.ne.s32.totalorder %s3118_s23, 0 }
  0x3e   : > { %s2699_s25 = sand.u32 (!%p3123_p12), 1, %s2515_s16   ;;  %p3124_p1 = scmp.ne.s32.totalorder (!%p3123_p12), %s3116_s21, 0 }
  0x3f   : > { %194 = sbr.rel (%p3123_p12) target bundleno = 667 (0x29b), region = 36  ;;  %s2121_s30 = sshll.u32 (!%p3123_p12), %s2699_s25, 4 }
  0x40   : > { %s197_s5 = scalar_lea.sflag (!%p3123_p12), [#allocation5], %s2699_s25  ;;  %s200_s6 = scalar_lea.vmem (!%p3123_p12), [#allocation4], %s2121_s30 }
  0x44   : > { %2498 = dma.done.wait (%p3124_p1), %s197_s5, 256  }
  0x45   : > { %2500 = vsyncadd (%p3124_p1), %s197_s5, 4294967040  ;;  %p3125_p4 = scmp.eq.s32.totalorder %s2613_s19, 0 }
  0x47   : > { %2502 = dma.done.wait (%p3125_p4), [#allocation8], 256   ;;  %p3126_p6 = pmov %p3125_p4 }
  0x48   : > { %v266_v0 = vlaneseq  ;;  %v2529_v1 = vmov 0   ;;  %v233_v5 = vld [vmem:[%s200_s6] sm:$0xff]  ;;  %v234_v6 = vld [vmem:[%s200_s6 + $0x8] sm:$0xff]  ;;  %s2530_s21 = smov 8   ;;  %s2531_s23 = smov 23   ;;  %vm249_vm0 = vcmask 1043520  }
  0x49   : > { %2504 = vsyncadd (%p3126_p6), [#allocation8], 4294967040  ;;  %230 = vst [vmem:[#allocation2] sm:$0xff] %v2529_v1  ;;  %688 = vmatprep.mubr.bf16.mxu0 %v2529_v1  ;;  %1144 = vmatprep.mubr.bf16.mxu1 %v2529_v1  ;;  %v479_v7 = vld [vmem:[#allocation7] sm:$0x11]  ;;  %v2254_v10 = vpack.c.bf16 %v234_v6, %v233_v5  ;;  %s2532_s24 = smov 25  }
  0x4a   : > { %231 = vst [vmem:[#allocation2 + $0x8] sm:$0xff] %v2529_v1  ;;  %232 = vst [vmem:[#allocation2 + $0x10] sm:$0xf] %v2529_v1  ;;  %v267_v2 = vshrl.u32 %v266_v0, 7  ;;  %2352 = vset.pattern.permute.xlu0 %v2529_v1  ;;  %v2137_v11 = vcombine.low %v479_v7, %v479_v7  ;;  %v2138_v12 = vcombine.high %v479_v7, %v479_v7  ;;  %v543_v13 = vld [vmem:[#allocation7] sm:$0x22] }
  0x4b   : > { %v432_v14 = vld [vmem:[#allocation7] sm:$0x22]  ;;  %v370_v15 = vld [vmem:[#allocation7] sm:$0x11]  ;;  %v2140_v16 = vcombine.low %v543_v13, %v543_v13  ;;  %v2141_v17 = vcombine.high %v543_v13, %v543_v13  ;;  %242 = vrot.lane.b32.xlu0 %v2254_v10, %s2530_s21  ;;  %v998_v38 = vld [vmem:[#allocation7] sm:$0x44] }
  0x4c   : > { %v2719_v3 = vsub.s32 0, %v267_v2  ;;  %v2721_v4 = vsub.s32 1, %v267_v2  ;;  %v2723_v8 = vsub.s32 2, %v267_v2  ;;  %v2725_v9 = vsub.s32 3, %v267_v2  ;;  %v321_v28 = vld [vmem:[#allocation7] sm:$0x22] }
  0x4d   : > { %v2134_v18 = vcombine.low %v432_v14, %v432_v14  ;;  %v2135_v19 = vcombine.high %v432_v14, %v432_v14  ;;  %v486_v20 = vpack.i.b16 %v2137_v11, %v2137_v11  ;;  %v493_v21 = vpack.i.b16 %v2138_v12, %v2138_v12  ;;  %v932_v33 = vld [vmem:[#allocation7] sm:$0x22]  ;;  %v881_v43 = vld [vmem:[#allocation7] sm:$0x44]  ;;  %s2533_s26 = smov 9   ;;  %s2534_s28 = smov 7  }
  0x4e   : > { %v2131_v22 = vcombine.low %v370_v15, %v370_v15  ;;  %v2132_v23 = vcombine.high %v370_v15, %v370_v15  ;;  %v550_v24 = vpack.i.b16 %v2140_v16, %v2140_v16  ;;  %v557_v25 = vpack.i.b16 %v2141_v17, %v2141_v17  ;;  %v765_v56 = vld [vmem:[#allocation7] sm:$0x44]  ;;  %v816_v10 = vld [vmem:[#allocation7] sm:$0x22]  ;;  %s2535_s29 = smov 121   ;;  %s2536_s7 = smov 38  }
  0x4f   : > { %v439_v26 = vpack.i.b16 %v2134_v18, %v2134_v18  ;;  %v446_v27 = vpack.i.b16 %v2135_v19, %v2135_v19  ;;  %v491_v29 = vrot.slane %v486_v20, %v2719_v3  ;;  %v498_v30 = vrot.slane %v493_v21, %v2719_v3  ;;  %v257_v19 = vld [vmem:[#allocation7] sm:$0x11]  ;;  %s2537_s8 = smov 42   ;;  %s2538_s12 = smov 10  }
  0x50   : > { %v377_v31 = vpack.i.b16 %v2131_v22, %v2131_v22  ;;  %v384_v32 = vpack.i.b16 %v2132_v23, %v2132_v23  ;;  %v555_v34 = vrot.slane %v550_v24, %v2721_v4  ;;  %v562_v35 = vrot.slane %v557_v25, %v2721_v4  ;;  %s2539_s13 = smov 106   ;;  %s2540_s11 = smov 6  }
  0x51   : > { %v444_v36 = vrot.slane %v439_v26, %v2721_v4  ;;  %v451_v37 = vrot.slane %v446_v27, %v2721_v4  ;;  %v2139_v39 = vcombine.low %v491_v29, %v498_v30  ;;  %v2128_v42 = vcombine.low %v321_v28, %v321_v28  ;;  %s2541_s14 = smov 119   ;;  %s2542_s20 = smov 102  }
  0x52   : > { %v382_v40 = vrot.slane %v377_v31, %v2719_v3  ;;  %v389_v41 = vrot.slane %v384_v32, %v2719_v3  ;;  %v2142_v44 = vcombine.low %v555_v34, %v562_v35  ;;  %v2129_v46 = vcombine.high %v321_v28, %v321_v28  ;;  %v699_v28 = vld [vmem:[#allocation7] sm:$0x22]  ;;  %s2543_s5 = smov 76   ;;  %s2544_s6 = smov 16  }
  0x53   : > { %v2136_v45 = vcombine.low %v444_v36, %v451_v37  ;;  %v2167_v47 = vcombine.low %v932_v33, %v932_v33  ;;  %504 = vrot.lane.b32.xlu1 %v2139_v39, %s2531_s23  ;;  %v328_v49 = vpack.i.b16 %v2128_v42, %v2128_v42  ;;  %v2168_v50 = vcombine.high %v932_v33, %v932_v33  ;;  %v1441_v37 = vld [vmem:[#allocation7 + $0x8] sm:$0x11]  ;;  %s2545_s23 = smov 68   ;;  %p3127_p3 = scmp.ne.s32.totalorder %s3121_s10, 0 }
  0x54   : > { %v2133_v48 = vcombine.low %v382_v40, %v389_v41  ;;  %v2170_v51 = vcombine.low %v998_v38, %v998_v38  ;;  %568 = vrot.lane.b32.xlu0 %v2142_v44, %s2532_s24  ;;  %v335_v52 = vpack.i.b16 %v2129_v46, %v2129_v46  ;;  %v2171_v54 = vcombine.high %v998_v38, %v998_v38  ;;  %v1829_v46 = vld [vmem:[#allocation7 + $0x8] sm:$0x22]  ;;  %s2546_s24 = smov 12  }
  0x55   : > { %v939_v53 = vshrl.u32 %v2167_v47, 16  ;;  %v2164_v55 = vcombine.low %v881_v43, %v881_v43  ;;  %v333_v57 = vrot.slane %v328_v49, %v2721_v4  ;;  %v947_v58 = vshrl.u32 %v2168_v50, 16 }
  0x56   : > { %v1005_v59 = vshrl.u32 %v2170_v51, 16  ;;  %v2165_v60 = vcombine.high %v881_v43, %v881_v43  ;;  %v340_v61 = vrot.slane %v335_v52, %v2721_v4  ;;  %v1013_v63 = vshrl.u32 %v2171_v54, 16 }
  0x57   : > { %v940_v62 = vpack.i.b16 %v939_v53, %v939_v53  ;;  %v888_v0 = vshrl.u32 %v2164_v55, 16  ;;  %457 = vrot.lane.b32.xlu1 %v2136_v45, %s2533_s26  ;;  %v948_v2 = vpack.i.b16 %v947_v58, %v947_v58  ;;  %v2158_v7 = vcombine.low %v765_v56, %v765_v56  ;;  %v1380_v58 = vld [vmem:[#allocation7] sm:$0x88] }
  0x58   : > { %v1006_v5 = vpack.i.b16 %v1005_v59, %v1005_v59  ;;  %v896_v6 = vshrl.u32 %v2165_v60, 16  ;;  %395 = vrot.lane.b32.xlu0 %v2133_v48, %s2534_s28  ;;  %v2130_v11 = vcombine.low %v333_v57, %v340_v61  ;;  %v1014_v13 = vpack.i.b16 %v1013_v63, %v1013_v63  ;;  %v1331_v63 = vld [vmem:[#allocation7 + $0x8] sm:$0x11] }
  0x59   : > { %v945_v12 = vrot.slane %v940_v62, %v2721_v4  ;;  %v889_v14 = vpack.i.b16 %v888_v0, %v888_v0  ;;  %v953_v15 = vrot.slane %v948_v2, %v2721_v4  ;;  %v2159_v18 = vcombine.high %v765_v56, %v765_v56 }
  0x5a   : > { %v1011_v16 = vrot.slane %v1006_v5, %v2723_v8  ;;  %v897_v17 = vpack.i.b16 %v896_v6, %v896_v6  ;;  %v1019_v20 = vrot.slane %v1014_v13, %v2723_v8  ;;  %v772_v22 = vshrl.u32 %v2158_v7, 16 }
  0x5b   : > { %v894_v21 = vrot.slane %v889_v14, %v2723_v8  ;;  %v2161_v23 = vcombine.low %v816_v10, %v816_v10  ;;  %346 = vrot.lane.b32.xlu1 %v2130_v11, %s2535_s29  ;;  %v2169_v24 = vcombine.low %v945_v12, %v953_v15  ;;  %v780_v26 = vshrl.u32 %v2159_v18, 16 }
  0x5c   : > { %v902_v25 = vrot.slane %v897_v17, %v2723_v8  ;;  %v2162_v27 = vcombine.high %v816_v10, %v816_v10  ;;  %v2172_v29 = vcombine.low %v1011_v16, %v1019_v20  ;;  %v773_v30 = vpack.i.b16 %v772_v22, %v772_v22  ;;  %v1735_v17 = vld [vmem:[#allocation7 + $0x8] sm:$0x22]  ;;  %v1219_v22 = vld [vmem:[#allocation7 + $0x8] sm:$0x11] }
  0x5d   : > { %v823_v31 = vshrl.u32 %v2161_v23, 16  ;;  %v2125_v32 = vcombine.low %v257_v19, %v257_v19  ;;  %959 = vrot.lane.b32.xlu0 %v2169_v24, %s2536_s7  ;;  %v781_v34 = vpack.i.b16 %v780_v26, %v780_v26  ;;  %v2126_v36 = vcombine.high %v257_v19, %v257_v19  ;;  %s2547_s7 = smov 4  }
  0x5e   : > { %v2166_v33 = vcombine.low %v894_v21, %v902_v25  ;;  %v831_v35 = vshrl.u32 %v2162_v27, 16  ;;  %v778_v38 = vrot.slane %v773_v30, %v2723_v8  ;;  %v2155_v41 = vcombine.low %v699_v28, %v699_v28 }
  0x5f   : > { %v824_v39 = vpack.i.b16 %v823_v31, %v823_v31  ;;  %v264_v40 = vpack.i.b16 %v2125_v32, %v2125_v32  ;;  %1025 = vrot.lane.b32.xlu1 %v2172_v29, %s2537_s8  ;;  %v786_v42 = vrot.slane %v781_v34, %v2723_v8  ;;  %v271_v44 = vpack.i.b16 %v2126_v36, %v2126_v36  ;;  %v1268_v31 = vld [vmem:[#allocation7] sm:$0x88]  ;;  %v1639_v36 = vld [vmem:[#allocation7 + $0x8] sm:$0x22]  ;;  %s2548_s8 = smov 120  }
  0x60   : > { %v832_v43 = vpack.i.b16 %v831_v35, %v831_v35  ;;  %v2156_v45 = vcombine.high %v699_v28, %v699_v28  ;;  %v706_v49 = vshrl.u32 %v2155_v41, 16  ;;  %v2201_v50 = vcombine.low %v1441_v37, %v1441_v37 }
  0x61   : > { %v829_v47 = vrot.slane %v824_v39, %v2721_v4  ;;  %v269_v48 = vrot.slane %v264_v40, %v2719_v3  ;;  %908 = vrot.lane.b32.xlu0 %v2166_v33, %s2538_s12  ;;  %v2160_v51 = vcombine.low %v778_v38, %v786_v42  ;;  %v276_v53 = vrot.slane %v271_v44, %v2719_v3  ;;  %s2549_s12 = smov 104  }
  0x62   : > { %v837_v52 = vrot.slane %v832_v43, %v2721_v4  ;;  %v714_v54 = vshrl.u32 %v2156_v45, 16  ;;  %v707_v55 = vpack.i.b16 %v706_v49, %v706_v49  ;;  %v2202_v8 = vcombine.high %v1441_v37, %v1441_v37  ;;  %v1155_v49 = vld [vmem:[#allocation7] sm:$0x88] }
  0x63   : > { %v1448_v56 = vpack.i.b16 %v2201_v50, %v2201_v50  ;;  %v2232_v57 = vcombine.low %v1829_v46, %v1829_v46  ;;  %792 = vrot.lane.b32.xlu1 %v2160_v51, %s2539_s13  ;;  %v2127_v60 = vcombine.low %v269_v48, %v276_v53  ;;  %v2233_v62 = vcombine.high %v1829_v46, %v1829_v46  ;;  %s2550_s13 = smov 88  }
  0x64   : > { %v2163_v59 = vcombine.low %v829_v47, %v837_v52  ;;  %v715_v61 = vpack.i.b16 %v714_v54, %v714_v54  ;;  %v712_v0 = vrot.slane %v707_v55, %v2721_v4  ;;  %v1455_v5 = vpack.i.b16 %v2202_v8, %v2202_v8 }
  0x65   : > { %v1453_v2 = vrot.slane %v1448_v56, %v2719_v3  ;;  %v1836_v6 = vshrl.u32 %v2232_v57, 16  ;;  %v1844_v10 = vshrl.u32 %v2233_v62, 16  ;;  %v2198_v11 = vcombine.low %v1380_v58, %v1380_v58 }
  0x66   : > { %843 = vrot.lane.b32.xlu0 %v2163_v59, %s2540_s11  ;;  %v720_v7 = vrot.slane %v715_v61, %v2721_v4  ;;  %v2199_v12 = vcombine.high %v1380_v58, %v1380_v58  ;;  %v1460_v13 = vrot.slane %v1455_v5, %v2719_v3  ;;  %v2195_v15 = vcombine.low %v1331_v63, %v1331_v63  ;;  %s2551_s11 = smov 56  }
  0x67   : > { %v1837_v14 = vpack.i.b16 %v1836_v6, %v1836_v6  ;;  %v2196_v16 = vcombine.high %v1331_v63, %v1331_v63  ;;  %282 = vrot.lane.b32.xlu1 %v2127_v60, %s2541_s14  ;;  %v1845_v19 = vpack.i.b16 %v1844_v10, %v1844_v10  ;;  %v1387_v20 = vpack.i.b16 %v2198_v11, %v2198_v11 }
  0x68   : > { %v2157_v18 = vcombine.low %v712_v0, %v720_v7  ;;  %v1394_v21 = vpack.i.b16 %v2199_v12, %v2199_v12  ;;  %v2203_v23 = vcombine.low %v1453_v2, %v1460_v13  ;;  %v1338_v25 = vpack.i.b16 %v2195_v15, %v2195_v15 }
  0x69   : > { %v1842_v24 = vrot.slane %v1837_v14, %v2721_v4  ;;  %v1345_v26 = vpack.i.b16 %v2196_v16, %v2196_v16  ;;  %v1850_v27 = vrot.slane %v1845_v19, %v2721_v4  ;;  %v1392_v28 = vrot.slane %v1387_v20, %v2725_v9 }
  0x6a   : > { %726 = vrot.lane.b32.xlu0 %v2157_v18, %s2542_s20  ;;  %v1399_v29 = vrot.slane %v1394_v21, %v2725_v9  ;;  %v2226_v30 = vcombine.low %v1735_v17, %v1735_v17  ;;  %v1343_v32 = vrot.slane %v1338_v25, %v2719_v3  ;;  %v2227_v34 = vcombine.high %v1735_v17, %v1735_v17  ;;  %v1814_v17 = vld [vmem:[#allocation2 + $0x10] sm:$0xf]  ;;  %v1783_v18 = vld [vmem:[#allocation7 + $0x8] sm:$0x11]  ;;  %s2552_s20 = smov 24  }
  0x6b   : > { %v1350_v33 = vrot.slane %v1345_v26, %v2719_v3  ;;  %v2189_v35 = vcombine.low %v1219_v22, %v1219_v22  ;;  %1466 = vrot.lane.b32.xlu1 %v2203_v23, %s2543_s5  ;;  %v2234_v37 = vcombine.low %v1842_v24, %v1850_v27  ;;  %v2190_v40 = vcombine.high %v1219_v22, %v1219_v22 }
  0x6c   : > { %v2200_v38 = vcombine.low %v1392_v28, %v1399_v29  ;;  %v1742_v39 = vshrl.u32 %v2226_v30, 16  ;;  %v1750_v42 = vshrl.u32 %v2227_v34, 16  ;;  %v2192_v44 = vcombine.low %v1268_v31, %v1268_v31 }
  0x6d   : > { %v2197_v41 = vcombine.low %v1343_v32, %v1350_v33  ;;  %v1226_v43 = vpack.i.b16 %v2189_v35, %v2189_v35  ;;  %v1233_v46 = vpack.i.b16 %v2190_v40, %v2190_v40  ;;  %v2193_v47 = vcombine.high %v1268_v31, %v1268_v31 }
  0x6e   : > { %1856 = vrot.lane.b32.xlu0 %v2234_v37, %s2544_s6  ;;  %v1743_v45 = vpack.i.b16 %v1742_v39, %v1742_v39  ;;  %v2220_v48 = vcombine.low %v1639_v36, %v1639_v36  ;;  %v1751_v50 = vpack.i.b16 %v1750_v42, %v1750_v42  ;;  %v1275_v52 = vpack.i.b16 %v2192_v44, %v2192_v44 }
  0x6f   : > { %v1231_v51 = vrot.slane %v1226_v43, %v2719_v3  ;;  %v2221_v53 = vcombine.high %v1639_v36, %v1639_v36  ;;  %1405 = vrot.lane.b32.xlu1 %v2200_v38, %s2545_s23  ;;  %v1238_v55 = vrot.slane %v1233_v46, %v2719_v3  ;;  %v1282_v8 = vpack.i.b16 %v2193_v47, %v2193_v47 }
  0x70   : > { %v1748_v54 = vrot.slane %v1743_v45, %v2721_v4  ;;  %v1646_v56 = vshrl.u32 %v2220_v48, 16  ;;  %v1756_v57 = vrot.slane %v1751_v50, %v2721_v4  ;;  %v1280_v58 = vrot.slane %v1275_v52, %v2725_v9 }
  0x71   : > { %v1654_v59 = vshrl.u32 %v2221_v53, 16  ;;  %v2186_v60 = vcombine.low %v1155_v49, %v1155_v49  ;;  %v2191_v61 = vcombine.low %v1231_v51, %v1238_v55  ;;  %v1287_v62 = vrot.slane %v1282_v8, %v2725_v9 }
  0x72   : > { %1356 = vrot.lane.b32.xlu0 %v2197_v41, %s2546_s24  ;;  %v1647_v63 = vpack.i.b16 %v1646_v56, %v1646_v56  ;;  %v2187_v0 = vcombine.high %v1155_v49, %v1155_v49  ;;  %v2228_v2 = vcombine.low %v1748_v54, %v1756_v57  ;;  %v2230_v19 = vcombine.high %v1783_v18, %v1783_v18  ;;  %s2557_s24 = smov 118  }
  0x73   : > { %v1655_v5 = vpack.i.b16 %v1654_v59, %v1654_v59  ;;  %v1162_v6 = vpack.i.b16 %v2186_v60, %v2186_v60  ;;  %v2194_v11 = vcombine.low %v1280_v58, %v1287_v62  ;;  %vm250_vm1 = vcmask 1047556  }
  0x74   : > { %v1652_v7 = vrot.slane %v1647_v63, %v2721_v4  ;;  %v1169_v10 = vpack.i.b16 %v2187_v0, %v2187_v0  ;;  %1762 = vrot.lane.b32.xlu1 %v2228_v2, %s2544_s6  ;;  %vm245_vm2 = vcmask 64512   ;;  %vm253_vm3 = vcmask 60416   ;;  %vm251_vm4 = vmor %vm250_vm1, %vm249_vm0 }
  0x75   : > { %v1660_v12 = vrot.slane %v1655_v5, %v2721_v4  ;;  %v1167_v13 = vrot.slane %v1162_v6, %v2725_v9  ;;  %v2229_v4 = vcombine.low %v1783_v18, %v1783_v18  ;;  %v1798_v21 = vshrl.u32 %v2230_v19, 16 }
  0x76   : > { %1244 = vrot.lane.b32.xlu0 %v2191_v61, %s2543_s5  ;;  %v1174_v14 = vrot.slane %v1169_v10, %v2725_v9  ;;  %vm571_vm5 = vcmask 203776   ;;  %vm1028_vm6 = vcmask 343040   ;;  %s2553_s5 = smov 103   ;;  %vm507_vm7 = vcmask 187392  }
  0x77   : > { %v2222_v15 = vcombine.low %v1652_v7, %v1660_v12  ;;  %v1790_v20 = vshrl.u32 %v2229_v4, 16  ;;  %v1799_v25 = vpack.i.b16 %v1798_v21, %v1798_v21  ;;  %vm962_vm8 = vcmask 310272  }
  0x78   : > { %1293 = vrot.lane.b32.xlu1 %v2194_v11, %s2547_s7  ;;  %v2188_v16 = vcombine.low %v1167_v13, %v1174_v14  ;;  %vm301_vm9 = vcmask 72704   ;;  %vm911_vm10 = vcmask 80896   ;;  %vm349_vm11 = vcmask 990208   ;;  %s2559_s7 = smov 52  }
  0x79   : > { %v1791_v24 = vpack.i.b16 %v1790_v20, %v1790_v20  ;;  %v1804_v27 = vrot.slane %v1799_v25, %v2719_v3  ;;  %vm364_vm12 = vcmask 56320   ;;  %vm795_vm13 = vcmask 867328  }
  0x7a   : > { %1666 = vrot.lane.b32.xlu0 %v2222_v15, %s2544_s6  ;;  %s2555_s6 = smov 105   ;;  %vm846_vm14 = vcmask 48128   ;;  %vm285_vm15 = vcmask 973824   ;;  %vm729_vm0 = vcmask 834560   ;;  %vm1247_vm1 = vcmask 621568  }
  0x7b   : > { %v1796_v26 = vrot.slane %v1791_v24, %v2719_v3 }
  0x7c   : > { %1180 = vrot.lane.b32.xlu1 %v2188_v16, %s2545_s23  ;;  %s2556_s23 = smov 90  }
  0x7d   : > { %v2231_v30 = vcombine.low %v1796_v26, %v1804_v27 }
  0x80   : > { %1819 = vrot.lane.b32.xlu1 %v1814_v17, %s2548_s8 }
  0xbd   : > { %v243_v9 = vpop.permute.xlu0 %242 }
  0xbe   : > { %v244_v22 = vrot.slane %v243_v9, 4 }
  0xc0   : > { %v246_v23 = vsel %vm245_vm2, %v244_v22, %v243_v9  ;;  %254 = vst.msk [vmem:[#allocation2 + $0xc] sm:$0xf] %vm253_vm3, %v244_v22  ;;  %vm1669_vm3 = vcmask 130048  }
  0xc1   : > { %252 = vst.msk [vmem:[#allocation2 + $0x4] sm:$0xff] %vm251_vm4, %v246_v23  ;;  %vm1183_vm4 = vcmask 556032  }
  0xc5   : > { %v505_v35 = vpop.permute.xlu1 %504 }
  0xc6   : > { %v569_v42 = vpop.permute.xlu0 %568  ;;  %v506_v53 = vrot.slane %v505_v35, 4 }
  0xc7   : > { %v527_v29 = vld [vmem:[#allocation2 + $0xc] sm:$0xf]  ;;  %v570_v44 = vrot.slane %v569_v42, 4 }
  0xc8   : > { %v2785_v28 = vld [vmem:[#allocation2 + $0x4] sm:$0xff]  ;;  %532 = vrot.lane.b32.xlu1 %v527_v29, %s2549_s12  ;;  %v982_v31 = vld [vmem:[#allocation2 + $0xc] sm:$0xf]  ;;  %v508_v61 = vsel %vm507_vm7, %v506_v53, %v505_v35  ;;  %vm1213_vm7 = vcmask 457728  }
  0xc9   : > { %530 = vrot.lane.b32.xlu0 %v2785_v28, %s2549_s12  ;;  %v2788_v32 = vld [vmem:[#allocation2 + $0x8] sm:$0xff]  ;;  %v2800_v37 = vpop.permute.xlu1 %457  ;;  %v2802_v38 = vld [vmem:[#allocation2] sm:$0xff]  ;;  %v572_v51 = vsel %vm571_vm5, %v570_v44, %v569_v42  ;;  %v511_v0 = vmul.bf16 %v508_v61, %v2785_v28  ;;  %s2560_s12 = smov 112   ;;  %vm1359_vm5 = vcmask 97280  }
  0xca   : > { %v2792_v33 = vmul.bf16 %v2231_v30, %v2788_v32  ;;  %v416_v34 = vld [vmem:[#allocation2 + $0xc] sm:$0xf]  ;;  %v306_v43 = vld [vmem:[#allocation2 + $0x8] sm:$0xf]  ;;  %v2816_v48 = vpop.permute.xlu0 %395  ;;  %v575_v54 = vmul.bf16 %v572_v51, %v2785_v28  ;;  %v459_v2 = vrot.slane %v2800_v37, 4 }
  0xcb   : > { %v866_v36 = vld [vmem:[#allocation2 + $0xc] sm:$0xf]  ;;  %v749_v47 = vld [vmem:[#allocation2 + $0x8] sm:$0xf]  ;;  %v397_v4 = vrot.slane %v2816_v48, 4 }
  0xcc   : > { %987 = vrot.lane.b32.xlu1 %v982_v31, %s2550_s13  ;;  %v1426_v39 = vld [vmem:[#allocation2 + $0xc] sm:$0xf]  ;;  %v460_v14 = vsel %vm301_vm9, %v459_v2, %v2800_v37 }
  0xcd   : > { %985 = vrot.lane.b32.xlu0 %v2785_v28, %s2550_s13  ;;  %v1316_v40 = vld [vmem:[#allocation2 + $0xc] sm:$0xf]  ;;  %v2809_v41 = vpop.permute.xlu1 %346  ;;  %v463_v18 = vmul.bf16 %v2785_v28, %v460_v14  ;;  %v398_v35 = vsel %vm364_vm12, %v397_v4, %v2816_v48  ;;  %s2561_s13 = smov 22  }
  0xce   : > { %v542_v45 = vld [vmem:[#allocation2 + $0xc] sm:$0xf]  ;;  %v348_v9 = vrot.slane %v2809_v41, 4 }
  0xcf   : > { %v576_v49 = vmul.bf16 %v570_v44, %v542_v45  ;;  %v997_v52 = vld [vmem:[#allocation2 + $0xc] sm:$0xf]  ;;  %v960_v56 = vpop.permute.xlu0 %959 }
  0xd0   : > { %421 = vrot.lane.b32.xlu1 %v416_v34, %s2548_s8  ;;  %v478_v8 = vld [vmem:[#allocation2 + $0xc] sm:$0xf]  ;;  %v961_v59 = vrot.slane %v960_v56, 4  ;;  %v350_v26 = vsel %vm349_vm11, %v348_v9, %v2809_v41  ;;  %v401_v41 = vmul.bf16 %v2785_v28, %v398_v35 }
  0xd1   : > { %419 = vrot.lane.b32.xlu0 %v2785_v28, %s2548_s8  ;;  %v1026_v46 = vpop.permute.xlu1 %1025  ;;  %v512_v58 = vmul.bf16 %v506_v53, %v478_v8  ;;  %v931_v62 = vld [vmem:[#allocation2 + $0xc] sm:$0xf]  ;;  %v353_v30 = vmul.bf16 %v350_v26, %v2802_v38  ;;  %v320_v8 = vld [vmem:[#allocation2 + $0x8] sm:$0xf] }
  0xd2   : > { %v1027_v50 = vrot.slane %v1026_v46, 4  ;;  %v967_v5 = vmul.bf16 %v961_v59, %v931_v62  ;;  %v963_v6 = vsel %vm962_vm8, %v961_v59, %v960_v56  ;;  %v431_v10 = vld [vmem:[#allocation2 + $0xc] sm:$0xf]  ;;  %v354_v56 = vmul.bf16 %v348_v9, %v320_v8  ;;  %v764_v59 = vld [vmem:[#allocation2 + $0x8] sm:$0xf] }
  0xd3   : > { %v909_v63 = vpop.permute.xlu0 %908  ;;  %v464_v11 = vmul.bf16 %v459_v2, %v431_v10  ;;  %v966_v12 = vmul.bf16 %v963_v6, %v2785_v28  ;;  %v880_v16 = vld [vmem:[#allocation2 + $0xc] sm:$0xf]  ;;  %vm299_vm8 = vcmask 1043456  }
  0xd4   : > { %871 = vrot.lane.b32.xlu1 %v866_v36, %s2548_s8  ;;  %v1033_v55 = vmul.bf16 %v1027_v50, %v997_v52  ;;  %v1029_v57 = vsel %vm1028_vm6, %v1027_v50, %v1026_v46  ;;  %v910_v13 = vrot.slane %v909_v63, 4  ;;  %v369_v21 = vld [vmem:[#allocation2 + $0xc] sm:$0xf]  ;;  %vm1296_vm6 = vcmask 31744  }
  0xd5   : > { %869 = vrot.lane.b32.xlu0 %v2785_v28, %s2548_s8  ;;  %v1032_v60 = vmul.bf16 %v1029_v57, %v2785_v28  ;;  %v2824_v7 = vpop.permute.xlu1 %792  ;;  %v402_v23 = vmul.bf16 %v397_v4, %v369_v21  ;;  %v815_v29 = vld [vmem:[#allocation2 + $0xc] sm:$0xf] }
  0xd6   : > { %v916_v19 = vmul.bf16 %v910_v13, %v880_v16  ;;  %v912_v20 = vsel %vm911_vm10, %v910_v13, %v909_v63  ;;  %v794_v36 = vrot.slane %v2824_v7, 4  ;;  %v1379_v51 = vld [vmem:[#allocation2 + $0xc] sm:$0xf]  ;;  %v256_v63 = vld [vmem:[#allocation2 + $0x8] sm:$0xf]  ;;  %vm426_vm10 = vcmask 982016  }
  0xd7   : > { %v915_v24 = vmul.bf16 %v912_v20, %v2785_v28  ;;  %v1330_v14 = vld [vmem:[#allocation2 + $0xc] sm:$0xf] }
  0xd8   : > { %1431 = vrot.lane.b32.xlu1 %v1426_v39, %s2551_s11  ;;  %v844_v15 = vpop.permute.xlu0 %843  ;;  %v1440_v39 = vld [vmem:[#allocation2 + $0xc] sm:$0xf]  ;;  %v796_v44 = vsel %vm795_vm13, %v794_v36, %v2824_v7  ;;  %v698_v7 = vld [vmem:[#allocation2 + $0x8] sm:$0xf]  ;;  %vm586_vm13 = vcmask 842752  }
  0xd9   : > { %309 = vrot.lane.b32.xlu0 %v2802_v38, %s2530_s21  ;;  %v2830_v17 = vpop.permute.xlu1 %282  ;;  %v845_v25 = vrot.slane %v844_v15, 4  ;;  %v1720_v9 = vld [vmem:[#allocation2 + $0xc] sm:$0xf] }
  0xda   : > { %v284_v50 = vrot.slane %v2830_v17, 4  ;;  %v1734_v20 = vld [vmem:[#allocation2 + $0xc] sm:$0xf] }
  0xdb   : > { %v851_v31 = vmul.bf16 %v845_v25, %v815_v29  ;;  %v1267_v35 = vld [vmem:[#allocation2 + $0xc] sm:$0xf] }
  0xdc   : > { %1321 = vrot.lane.b32.xlu1 %v1316_v40, %s2548_s8  ;;  %v2836_v22 = vpop.permute.xlu0 %726  ;;  %v1828_v40 = vld [vmem:[#allocation2 + $0x10] sm:$0xf] }
  0xdd   : > { %752 = vrot.lane.b32.xlu0 %v2802_v38, %s2552_s20  ;;  %v1467_v27 = vpop.permute.xlu1 %1466 }
  0xde   : > { %v1468_v34 = vrot.slane %v1467_v27, 4 }
  0xe0   : > { %311 = vrot.lane.b32.xlu1 %v306_v43, %s2530_s21  ;;  %s2554_s21 = smov 86   ;;  %v1857_v37 = vpop.permute.xlu0 %1856  ;;  %v1473_v42 = vmul.bf16 %v1468_v34, %v1440_v39  ;;  %v1469_v62 = vsel %vm1247_vm1, %v1468_v34, %v1467_v27 }
  0xe1   : > { %1429 = vrot.lane.b32.xlu0 %v2785_v28, %s2551_s11  ;;  %v1858_v43 = vrot.slane %v1857_v37, 4  ;;  %v1406_v45 = vpop.permute.xlu1 %1405  ;;  %v1472_v2 = vmul.bf16 %v1469_v62, %v2785_v28 }
  0xe2   : > { %v1407_v48 = vrot.slane %v1406_v45, 4 }
  0xe3   : > { %v1863_v46 = vmul.bf16 %v1858_v43, %v1828_v40 }
  0xe4   : > { %754 = vrot.lane.b32.xlu1 %v749_v47, %s2552_s20  ;;  %v799_v47 = vmul.bf16 %v796_v44, %v2802_v38  ;;  %v1412_v53 = vmul.bf16 %v1407_v48, %v1379_v51  ;;  %s2563_s20 = smov 26   ;;  %v1357_v6 = vpop.permute.xlu0 %1356  ;;  %v1408_v13 = vsel %vm1183_vm4, %v1407_v48, %v1406_v45 }
  0xe5   : > { %1817 = vrot.lane.b32.xlu0 %v2788_v32, %s2548_s8 }
  0xe8   : > { %581 = vrot.lane.b32.xlu1 %v576_v49, %s2553_s5  ;;  %v847_v49 = vsel %vm846_vm14, %v845_v25, %v844_v15  ;;  %v1411_v15 = vmul.bf16 %v1408_v13, %v2785_v28  ;;  %v1218_v25 = vld [vmem:[#allocation2 + $0x8] sm:$0xf]  ;;  %vm1043_vm14 = vcmask 703488  }
  0xe9   : > { %1319 = vrot.lane.b32.xlu0 %v2785_v28, %s2548_s8  ;;  %v850_v52 = vmul.bf16 %v847_v49, %v2785_v28 }
  0xec   : > { %1038 = vrot.lane.b32.xlu1 %v1033_v55, %s2554_s21  ;;  %v728_v55 = vrot.slane %v2836_v22, 4 }
  0xed   : > { %579 = vrot.lane.b32.xlu0 %v575_v54, %s2553_s5  ;;  %v286_v54 = vsel %vm285_vm15, %v284_v50, %v2830_v17 }
  0xee   : > { %v289_v57 = vmul.bf16 %v2802_v38, %v286_v54  ;;  %v734_v10 = vmul.bf16 %v728_v55, %v698_v7 }
  0xf0   : > { %517 = vrot.lane.b32.xlu1 %v512_v58, %s2555_s6  ;;  %v730_v58 = vsel %vm729_vm0, %v728_v55, %v2836_v22  ;;  %v1203_v55 = vld [vmem:[#allocation2 + $0x8] sm:$0xf]  ;;  %vm537_vm0 = vcmask 850944  }
  0xf1   : > { %1036 = vrot.lane.b32.xlu0 %v1032_v60, %s2554_s21  ;;  %v800_v60 = vmul.bf16 %v794_v36, %v764_v59  ;;  %v733_v61 = vmul.bf16 %v730_v58, %v2802_v38 }
  0xf4   : > { %972 = vrot.lane.b32.xlu1 %v967_v5, %s2556_s23  ;;  %v1859_v5 = vsel %vm1669_vm3, %v1858_v43, %v1857_v37 }
  0xf5   : > { %515 = vrot.lane.b32.xlu0 %v511_v0, %s2555_s6  ;;  %v290_v0 = vmul.bf16 %v284_v50, %v256_v63 }
  0xf8   : > { %469 = vrot.lane.b32.xlu1 %v464_v11, %s2541_s14  ;;  %v1862_v11 = vmul.bf16 %v1859_v5, %v2788_v32 }
  0xf9   : > { %970 = vrot.lane.b32.xlu0 %v966_v12, %s2556_s23  ;;  %v1358_v12 = vrot.slane %v1357_v6, 4 }
  0xfb   : > { %v1364_v16 = vmul.bf16 %v1358_v12, %v1330_v14  ;;  %v1360_v17 = vsel %vm1359_vm5, %v1358_v12, %v1357_v6  ;;  %vm926_vm5 = vcmask 965632  }
  0xfc   : > { %921 = vrot.lane.b32.xlu1 %v916_v19, %s2557_s24  ;;  %v1363_v4 = vmul.bf16 %v1360_v17, %v2785_v28  ;;  %v1245_v19 = vpop.permute.xlu0 %1244 }
  0xfd   : > { %467 = vrot.lane.b32.xlu0 %v463_v18, %s2541_s14  ;;  %s2558_s14 = smov 122   ;;  %v1763_v18 = vpop.permute.xlu1 %1762  ;;  %v1246_v22 = vrot.slane %v1245_v19, 4 }
  0xfe   : > { %v1764_v32 = vrot.slane %v1763_v18, 4 }
  0xff   : > { %v1252_v27 = vmul.bf16 %v1246_v22, %v1218_v25 }
 0x100   : > { %407 = vrot.lane.b32.xlu1 %v402_v23, %s2535_s29  ;;  %v1769_v21 = vmul.bf16 %v1764_v32, %v1734_v20 }
 0x101   : > { %919 = vrot.lane.b32.xlu0 %v915_v24, %s2557_s24  ;;  %v1294_v23 = vpop.permute.xlu1 %1293  ;;  %v1765_v24 = vsel %vm1669_vm3, %v1764_v32, %v1763_v18 }
 0x102   : > { %v1768_v26 = vmul.bf16 %v1765_v24, %v2785_v28  ;;  %v1295_v29 = vrot.slane %v1294_v23, 4 }
 0x104   : > { %856 = vrot.lane.b32.xlu1 %v851_v31, %s2558_s14  ;;  %v1667_v31 = vpop.permute.xlu0 %1666  ;;  %v1301_v37 = vmul.bf16 %v1295_v29, %v1267_v35  ;;  %v1297_v40 = vsel %vm1296_vm6, %v1295_v29, %v1294_v23  ;;  %vm810_vm6 = vcmask 179200  }
 0x105   : > { %357 = vrot.lane.b32.xlu0 %v353_v30, %s2534_s28  ;;  %v1248_v30 = vsel %vm1247_vm1, %v1246_v22, %v1245_v19  ;;  %v1181_v34 = vpop.permute.xlu1 %1180  ;;  %v1668_v39 = vrot.slane %v1667_v31, 4  ;;  %v1300_v43 = vmul.bf16 %v1297_v40, %v2785_v28  ;;  %vm522_vm1 = vcmask 859136  }
 0x106   : > { %v1251_v36 = vmul.bf16 %v1248_v30, %v2802_v38  ;;  %v1182_v45 = vrot.slane %v1181_v34, 4 }
 0x108   : > { %1478 = vrot.lane.b32.xlu1 %v1473_v42, %s2559_s7  ;;  %v1638_v42 = vld [vmem:[#allocation2 + $0x8] sm:$0xf] }
 0x109   : > { %405 = vrot.lane.b32.xlu0 %v401_v41, %s2535_s29  ;;  %s2562_s29 = smov 60   ;;  %v1820_v41 = vpop.permute.xlu1 %1819  ;;  %v1674_v44 = vmul.bf16 %v1668_v39, %v1638_v42 }
 0x10a   : > { %v1822_v13 = vrot.slane %v1820_v41, 4 }
 0x10c   : > { %1868 = vrot.lane.b32.xlu1 %v1863_v46, %s2560_s12  ;;  %v1670_v46 = vsel %vm1669_vm3, %v1668_v39, %v1667_v31  ;;  %vm992_vm3 = vcmask 719872  }
 0x10d   : > { %803 = vrot.lane.b32.xlu0 %v799_v47, %s2561_s13  ;;  %v1154_v47 = vld [vmem:[#allocation2 + $0x8] sm:$0xf]  ;;  %v1673_v48 = vmul.bf16 %v1670_v46, %v2802_v38 }
 0x10e   : > { %v1188_v49 = vmul.bf16 %v1182_v45, %v1154_v47 }
 0x110   : > { %1417 = vrot.lane.b32.xlu1 %v1412_v53, %s2562_s29 }
 0x111   : > { %854 = vrot.lane.b32.xlu0 %v850_v52, %s2558_s14  ;;  %v1184_v52 = vsel %vm1183_vm4, %v1182_v45, %v1181_v34  ;;  %vm977_vm4 = vcmask 736256  }
 0x114   : > { %359 = vrot.lane.b32.xlu1 %v354_v56, %s2534_s28  ;;  %s2565_s28 = smov 124  }
 0x115   : > { %293 = vrot.lane.b32.xlu0 %v289_v57, %s2533_s26  ;;  %v1624_v57 = vld [vmem:[#allocation2 + $0x8] sm:$0xf] }
 0x118   : > { %805 = vrot.lane.b32.xlu1 %v800_v60, %s2561_s13  ;;  %v2008_v60 = vld [vmem:[%s3109_s2] sm:$0xff]  ;;  %s2255_s13 = sshll.u32 %s2613_s19, 8  ;;  %s2019_s19 = scalar_lea.sflag [#allocation6], %s2699_s25 }
 0x119   : > { %737 = vrot.lane.b32.xlu0 %v733_v61, %s2563_s20  ;;  %s2031_s5 = scalar_lea.hbm %s3111_s4, %s2255_s13 }
 0x11c   : > { %295 = vrot.lane.b32.xlu1 %v290_v0, %s2533_s26  ;;  %s2564_s26 = smov 116  }
 0x11d   : > { %1476 = vrot.lane.b32.xlu0 %v1472_v2, %s2559_s7 }
 0x120   : > { %739 = vrot.lane.b32.xlu1 %v734_v10, %s2563_s20 }
 0x121   : > { %1866 = vrot.lane.b32.xlu0 %v1862_v11, %s2560_s12 }
 0x124   : > { %1369 = vrot.lane.b32.xlu1 %v1364_v16, %s2564_s26 }
 0x125   : > { %1415 = vrot.lane.b32.xlu0 %v1411_v15, %s2562_s29 }
 0x128   : > { %1725 = vrot.lane.b32.xlu1 %v1720_v9, %s2548_s8 }
 0x129   : > { %1367 = vrot.lane.b32.xlu0 %v1363_v4, %s2564_s26 }
 0x12c   : > { %1774 = vrot.lane.b32.xlu1 %v1769_v21, %s2560_s12 }
 0x12d   : > { %1723 = vrot.lane.b32.xlu0 %v2785_v28, %s2548_s8  ;;  %v1187_v28 = vmul.bf16 %v1184_v52, %v2802_v38 }
 0x130   : > { %1257 = vrot.lane.b32.xlu1 %v1252_v27, %s2559_s7 }
 0x131   : > { %1772 = vrot.lane.b32.xlu0 %v1768_v26, %s2560_s12 }
 0x134   : > { %1306 = vrot.lane.b32.xlu1 %v1301_v37, %s2565_s28 }
 0x135   : > { %1255 = vrot.lane.b32.xlu0 %v1251_v36, %s2559_s7 }
 0x138   : > { %1679 = vrot.lane.b32.xlu1 %v1674_v44, %s2560_s12 }
 0x139   : > { %1304 = vrot.lane.b32.xlu0 %v1300_v43, %s2565_s28 }
 0x13a   : > { %v2892_v50 = vpop.permute.xlu1 %532 }
 0x13b   : > { %v2894_v51 = vpop.permute.xlu0 %530  ;;  %v535_v27 = vrot.slane %v2892_v50, 4 }
 0x13c   : > { %1193 = vrot.lane.b32.xlu1 %v1188_v49, %s2562_s29  ;;  %v534_v29 = vrot.slane %v2894_v51, 4 }
 0x13d   : > { %1677 = vrot.lane.b32.xlu0 %v1673_v48, %s2560_s12 }
 0x13e   : > { %v2900_v53 = vpop.permute.xlu1 %987  ;;  %v536_v42 = vsel %vm299_vm8, %v534_v29, %v535_v27 }
 0x13f   : > { %v2902_v54 = vpop.permute.xlu0 %985  ;;  %v990_v43 = vrot.slane %v2900_v53, 4 }
 0x140   : > { %1208 = vrot.lane.b32.xlu1 %v1203_v55, %s2551_s11  ;;  %v989_v44 = vrot.slane %v2902_v54, 4 }
 0x141   : > { %1191 = vrot.lane.b32.xlu0 %v1187_v28, %s2562_s29  ;;  %v538_v28 = vsel %vm537_vm0, %v2894_v51, %v536_v42  ;;  %vm1374_vm0 = vcmask 949248   ;;  %s228_s29 = scalar_lea.vmem [#allocation9], %s2121_s30  ;;  %s2566_s30 = smov [#allocation9]  }
 0x142   : > { %v2906_v8 = vpop.permute.xlu1 %421  ;;  %s2033_s20 = sshll.u32 %s228_s29, 4  ;;  %s2034_s20 = int_to_ptr.vmem [resolvable:$true] %s2033_s20 }
 0x143   : > { %v2908_v56 = vpop.permute.xlu0 %419  ;;  %s2455_s21 = scalar_lea.vmem %s2034_s20, 256 }
 0x144   : > { %1629 = vrot.lane.b32.xlu1 %v1624_v57, %s2548_s8  ;;  %v991_v57 = vsel %vm299_vm8, %v989_v44, %v990_v43  ;;  %p2456_p8 = scmp.ne.s32.totalorder %s2034_s20, %s2455_s21 }
 0x145   : > { %1206 = vrot.lane.b32.xlu0 %v2802_v38, %s2551_s11 }
 0x146   : > { %v2913_v58 = vpop.permute.xlu1 %871  ;;  %p2457_p11 = pnand %p2456_p8, %p3127_p3 }
 0x147   : > { %v2915_v59 = vpop.permute.xlu0 %869 }
 0x148   : > { %p2458_p7 = pneg %p2457_p11 }
 0x149   : > { %1627 = vrot.lane.b32.xlu0 %v2802_v38, %s2548_s8  ;;  %s2459_s8 = sshll.u32 %s2566_s30, 4  ;;  %s2460_s8 = int_to_ptr.vmem [resolvable:$false] %s2459_s8 }
 0x14a   : > { %v1432_v61 = vpop.permute.xlu1 %1431  ;;  %s2461_s11 = scalar_lea.vmem %s2460_s8, 512  ;;  %p2462_p10 = scmp.lt.s32.totalorder %s2034_s20, %s2460_s8 }
 0x14b   : > { %v2922_v62 = vpop.permute.xlu0 %309  ;;  %v1434_v6 = vrot.slane %v1432_v61, 4  ;;  %v423_v61 = vrot.slane %v2908_v56, 4  ;;  %p2463_p2 = scmp.lt.s32.totalorder %s2461_s11, %s2455_s21 }
 0x14d   : > { %2011 = vperm.xlu0 %2352, %v2008_v60   ;;  %v424_v60 = vrot.slane %v2906_v8, 4  ;;  %v874_v8 = vrot.slane %v2913_v58, 4  ;;  %p2464_p13 = por %p2463_p2, %p2462_p10 }
 0x14e   : > { %v1322_v63 = vpop.permute.xlu1 %1321 }
 0x14f   : > { %v2924_v0 = vpop.permute.xlu0 %752  ;;  %v1324_v4 = vrot.slane %v1322_v63, 4  ;;  %p2465_p0 = pnand %p2464_p13, %p2458_p7 }
 0x152   : > { %v2926_v2 = vpop.permute.xlu1 %311 }
 0x153   : > { %v1430_v5 = vpop.permute.xlu0 %1429 }
 0x154   : > { %v1433_v7 = vrot.slane %v1430_v5, 4 }
 0x156   : > { %v1435_v38 = vsel %vm299_vm8, %v1433_v7, %v1434_v6  ;;  %v2932_v11 = vpop.permute.xlu1 %754 }
 0x157   : > { %v2930_v10 = vsel %vm1213_vm7, %v1430_v5, %v1435_v38  ;;  %v1818_v12 = vpop.permute.xlu0 %1817 }
 0x158   : > { %v1821_v14 = vrot.slane %v1818_v12, 4 }
 0x15a   : > { %v1823_v15 = vsel %vm299_vm8, %v1821_v14, %v1822_v13  ;;  %v582_v17 = vpop.permute.xlu1 %581  ;;  %v993_v13 = vsel %vm992_vm3, %v2902_v54, %v991_v57 }
 0x15b   : > { %v2936_v16 = vsel %vm426_vm10, %v1818_v12, %v1823_v15  ;;  %v1320_v18 = vpop.permute.xlu0 %1319  ;;  %v584_v24 = vrot.slane %v582_v17, 4  ;;  %v425_v15 = vsel %vm299_vm8, %v423_v61, %v424_v60  ;;  %v873_v17 = vrot.slane %v2915_v59, 4 }
 0x15c   : > { %v2242_v32 = vcombine.low %v2792_v33, %v2936_v16  ;;  %v2243_v19 = vcombine.high %v2792_v33, %v2936_v16  ;;  %v1323_v9 = vrot.slane %v1320_v18, 4  ;;  %v314_v60 = vrot.slane %v2926_v2, 4 }
 0x15e   : > { %v1325_v20 = vsel %vm299_vm8, %v1323_v9, %v1324_v4  ;;  %v1039_v22 = vpop.permute.xlu1 %1038 }
 0x15f   : > { %v2944_v21 = vsel %vm426_vm10, %v1320_v18, %v1325_v20  ;;  %v580_v23 = vpop.permute.xlu0 %579  ;;  %v1041_v35 = vrot.slane %v1039_v22, 4 }
 0x160   : > { %v583_v25 = vrot.slane %v580_v23, 4 }
 0x162   : > { %v585_v26 = vsel %vm299_vm8, %v583_v25, %v584_v24  ;;  %v518_v31 = vpop.permute.xlu1 %517  ;;  %v427_v25 = vsel %vm426_vm10, %v2908_v56, %v425_v15 }
 0x163   : > { %v587_v30 = vsel %vm586_vm13, %v580_v23, %v585_v26  ;;  %v1037_v34 = vpop.permute.xlu0 %1036  ;;  %v520_v48 = vrot.slane %v518_v31, 4  ;;  %v875_v26 = vsel %vm299_vm8, %v873_v17, %v874_v8  ;;  %vm1262_vm13 = vcmask 424960  }
 0x164   : > { %v1040_v36 = vrot.slane %v1037_v34, 4  ;;  %v2152_v37 = vcombine.high %v587_v30, %v587_v30  ;;  %v2151_v39 = vcombine.low %v587_v30, %v587_v30 }
 0x166   : > { %v1042_v40 = vsel %vm299_vm8, %v1040_v36, %v1041_v35  ;;  %2153 = vmatprep.subr.msk.bf16.mxu0 %vm299_vm8, %v2152_v37  ;;  %v651_v41 = vsel %vm299_vm8, %v2151_v39, 0  ;;  %v973_v46 = vpop.permute.xlu1 %972  ;;  %v876_v37 = vsel %vm426_vm10, %v2915_v59, %v875_v26 }
 0x167   : > { %v1044_v45 = vsel %vm1043_vm14, %v1037_v34, %v1042_v40  ;;  %663 = vmatpush1.bf16.msra.mxu0 %v651_v41  ;;  %v516_v47 = vpop.permute.xlu0 %515  ;;  %v975_v7 = vrot.slane %v973_v46, 4  ;;  %vm744_vm14 = vcmask 211968  }
 0x168   : > { %v519_v49 = vrot.slane %v516_v47, 4  ;;  %v2183_v50 = vcombine.high %v1044_v45, %v1044_v45  ;;  %v2182_v52 = vcombine.low %v1044_v45, %v1044_v45 }
 0x16a   : > { %v521_v55 = vsel %vm299_vm8, %v519_v49, %v520_v48  ;;  %2184 = vmatprep.subr.msk.bf16.mxu1 %vm299_vm8, %v2183_v50  ;;  %v1107_v53 = vsel %vm299_vm8, %v2182_v52, 0  ;;  %v470_v5 = vpop.permute.xlu1 %469 }
 0x16b   : > { %v523_v63 = vsel %vm522_vm1, %v516_v47, %v521_v55  ;;  %1119 = vmatpush1.bf16.msra.mxu1 %v1107_v53  ;;  %v971_v6 = vpop.permute.xlu0 %970  ;;  %v472_v20 = vrot.slane %v470_v5, 4  ;;  %v313_v5 = vrot.slane %v2922_v62, 4  ;;  %vm1311_vm1 = vcmask 1014784  }
 0x16c   : > { %v2149_v51 = vcombine.low %v523_v63, %v538_v28  ;;  %v2150_v38 = vcombine.high %v523_v63, %v538_v28  ;;  %v974_v12 = vrot.slane %v971_v6, 4 }
 0x16d   : > { %v315_v2 = vsel %vm299_vm8, %v313_v5, %v314_v60 }
 0x16e   : > { %v976_v14 = vsel %vm299_vm8, %v974_v12, %v975_v7  ;;  %664 = vmatprep.subr.bf16.mxu0 %v2150_v38  ;;  %v922_v4 = vpop.permute.xlu1 %921 }
 0x16f   : > { %v978_v18 = vsel %vm977_vm4, %v971_v6, %v976_v14  ;;  %665 = vmatpush1.bf16.msra.mxu0 %v2149_v51  ;;  %v468_v9 = vpop.permute.xlu0 %467  ;;  %v924_v30 = vrot.slane %v922_v4, 4 }
 0x170   : > { %v2180_v22 = vcombine.low %v978_v18, %v993_v13  ;;  %v2181_v23 = vcombine.high %v978_v18, %v993_v13  ;;  %v471_v24 = vrot.slane %v468_v9, 4 }
 0x172   : > { %v473_v54 = vsel %vm299_vm8, %v471_v24, %v472_v20  ;;  %1120 = vmatprep.subr.bf16.mxu1 %v2181_v23  ;;  %v408_v27 = vpop.permute.xlu1 %407 }
 0x173   : > { %v474_v58 = vsel %vm285_vm15, %v468_v9, %v473_v54  ;;  %1121 = vmatpush1.bf16.msra.mxu1 %v2180_v22  ;;  %v920_v29 = vpop.permute.xlu0 %919  ;;  %v410_v50 = vrot.slane %v408_v27, 4  ;;  %vm861_vm15 = vcmask 998400  }
 0x174   : > { %v2147_v31 = vcombine.low %v427_v25, %v474_v58  ;;  %v2148_v34 = vcombine.high %v427_v25, %v474_v58  ;;  %v923_v35 = vrot.slane %v920_v29, 4  ;;  %v757_v58 = vrot.slane %v2932_v11, 4 }
 0x175   : > { %v316_v11 = vsel %vm245_vm2, %v2922_v62, %v315_v2  ;;  %vm1198_vm2 = vcmask 490496  }
 0x176   : > { %v925_v36 = vsel %vm299_vm8, %v923_v35, %v924_v30  ;;  %666 = vmatprep.subr.bf16.mxu0 %v2148_v34  ;;  %v857_v56 = vpop.permute.xlu1 %856  ;;  %v756_v30 = vrot.slane %v2924_v0, 4 }
 0x177   : > { %v927_v39 = vsel %vm926_vm5, %v920_v29, %v925_v36  ;;  %667 = vmatpush1.bf16.msra.mxu0 %v2147_v31  ;;  %v358_v40 = vpop.permute.xlu0 %357  ;;  %v859_v61 = vrot.slane %v857_v56, 4 }
 0x178   : > { %v2178_v41 = vcombine.low %v876_v37, %v927_v39  ;;  %v2179_v42 = vcombine.high %v876_v37, %v927_v39  ;;  %v361_v28 = vrot.slane %v358_v40, 4 }
 0x17a   : > { %1122 = vmatprep.subr.bf16.mxu1 %v2179_v42  ;;  %v1479_v43 = vpop.permute.xlu1 %1478 }
 0x17b   : > { %1123 = vmatpush1.bf16.msra.mxu1 %v2178_v41  ;;  %v406_v44 = vpop.permute.xlu0 %405  ;;  %v1481_v18 = vrot.slane %v1479_v43, 4  ;;  %v758_v41 = vsel %vm299_vm8, %v756_v30, %v757_v58 }
 0x17c   : > { %v409_v49 = vrot.slane %v406_v44, 4 }
 0x17e   : > { %v2979_v45 = vpop.permute.xlu1 %1868  ;;  %v411_v55 = vsel %vm299_vm8, %v409_v49, %v410_v50 }
 0x17f   : > { %v804_v46 = vpop.permute.xlu0 %803  ;;  %v412_v6 = vsel %vm349_vm11, %v406_v44, %v411_v55  ;;  %vm759_vm11 = vcmask 195584   ;;  %v1871_v37 = vrot.slane %v2979_v45, 4 }
 0x180   : > { %v807_v7 = vrot.slane %v804_v46, 4  ;;  %v760_v55 = vsel %vm759_vm11, %v2924_v0, %v758_v41 }
 0x182   : > { %v2981_v47 = vpop.permute.xlu1 %1417 }
 0x183   : > { %v855_v48 = vpop.permute.xlu0 %854 }
 0x184   : > { %v858_v53 = vrot.slane %v855_v48, 4 }
 0x186   : > { %v360_v52 = vpop.permute.xlu1 %359  ;;  %v860_v13 = vsel %vm299_vm8, %v858_v53, %v859_v61  ;;  %v590_v53 = vld [vmem:[%s3108_s1] sm:$0x1] }
 0x187   : > { %v294_v59 = vpop.permute.xlu0 %293  ;;  %v362_v57 = vrot.slane %v360_v52, 4  ;;  %v862_v4 = vsel %vm861_vm15, %v855_v48, %v860_v13 }
 0x188   : > { %v297_v9 = vrot.slane %v294_v59, 4 }
 0x189   : > { %v363_v63 = vsel %vm299_vm8, %v361_v28, %v362_v57 }
 0x18a   : > { %v806_v51 = vpop.permute.xlu1 %805  ;;  %v365_v12 = vsel %vm364_vm12, %v358_v40, %v363_v63  ;;  %vm1684_vm12 = vcmask 916480  }
 0x18b   : > { %v738_v38 = vpop.permute.xlu0 %737  ;;  %v808_v14 = vrot.slane %v806_v51, 4  ;;  %v2146_v15 = vcombine.high %v365_v12, %v412_v6  ;;  %v2145_v8 = vcombine.low %v365_v12, %v412_v6  ;;  %v1689_v51 = vld [vmem:[#allocation7 + $0x8] sm:$0x11] }
 0x18c   : > { %v741_v39 = vrot.slane %v738_v38, 4  ;;  %v2223_v2 = vcombine.low %v1689_v51, %v1689_v51 }
 0x18d   : > { %v809_v17 = vsel %vm299_vm8, %v807_v7, %v808_v14  ;;  %668 = vmatprep.subr.bf16.mxu0 %v2146_v15  ;;  %v2173_v15 = vld [vmem:[%s3108_s1 + $0x1] sm:$0x1] }
 0x18e   : > { %669 = vmatpush1.bf16.msra.mxu0 %v2145_v8  ;;  %v296_v20 = vpop.permute.xlu1 %295  ;;  %v811_v23 = vsel %vm810_vm6, %v804_v46, %v809_v17  ;;  %v2224_v17 = vcombine.high %v1689_v51, %v1689_v51 }
 0x18f   : > { %v1477_v22 = vpop.permute.xlu0 %1476  ;;  %v298_v24 = vrot.slane %v296_v20, 4  ;;  %v2177_v25 = vcombine.high %v811_v23, %v862_v4  ;;  %v2176_v26 = vcombine.low %v811_v23, %v862_v4 }
 0x190   : > { %v1480_v54 = vrot.slane %v1477_v22, 4 }
 0x191   : > { %v300_v27 = vsel %vm299_vm8, %v297_v9, %v298_v24  ;;  %1124 = vmatprep.subr.bf16.mxu1 %v2177_v25  ;;  %v1704_v25 = vshrl.u32 %v2224_v17, 16 }
 0x192   : > { %v1482_v29 = vsel %vm299_vm8, %v1480_v54, %v1481_v18  ;;  %1125 = vmatpush1.bf16.msra.mxu1 %v2176_v26  ;;  %v740_v34 = vpop.permute.xlu1 %739  ;;  %v302_v36 = vsel %vm301_vm9, %v294_v59, %v300_v27  ;;  %v1420_v59 = vrot.slane %v2981_v47, 4  ;;  %vm645_vm9 = vcmask 588800  }
 0x193   : > { %v1483_v31 = vsel %vm1262_vm13, %v1477_v22, %v1482_v29  ;;  %v1867_v35 = vpop.permute.xlu0 %1866  ;;  %v742_v56 = vrot.slane %v740_v34, 4  ;;  %v2144_v43 = vcombine.high %v302_v36, %v316_v11  ;;  %v2143_v44 = vcombine.low %v302_v36, %v316_v11 }
 0x194   : > { %v1870_v40 = vrot.slane %v1867_v35, 4  ;;  %v2214_v42 = vcombine.high %v1483_v31, %v1483_v31  ;;  %v2213_v49 = vcombine.low %v1483_v31, %v1483_v31  ;;  %v1696_v54 = vshrl.u32 %v2223_v2, 16 }
 0x195   : > { %v743_v46 = vsel %vm299_vm8, %v741_v39, %v742_v56  ;;  %670 = vmatprep.subr.bf16.mxu0 %v2144_v43  ;;  %v1705_v31 = vpack.i.b16 %v1704_v25, %v1704_v25 }
 0x196   : > { %v1872_v48 = vsel %vm299_vm8, %v1870_v40, %v1871_v37  ;;  %v1370_v52 = vpop.permute.xlu1 %1369  ;;  %v745_v45 = vsel %vm744_vm14, %v738_v38, %v743_v46  ;;  %671 = vmatpush1.bf16.msra.mxu0 %v2143_v44  ;;  %v1546_v0 = vsel %vm299_vm8, %v2213_v49, 0 }
 0x197   : > { %v1873_v50 = vsel %vm1684_vm12, %v1867_v35, %v1872_v48  ;;  %v1416_v62 = vpop.permute.xlu0 %1415  ;;  %2215 = vmatprep.subr.msk.bf16.mxu0 %vm299_vm8, %v2214_v42  ;;  %v2175_v60 = vcombine.high %v745_v45, %v760_v55  ;;  %v2174_v61 = vcombine.low %v745_v45, %v760_v55  ;;  %v1372_v38 = vrot.slane %v1370_v52, 4  ;;  %v1688_v55 = vld [vmem:[#allocation2 + $0x4] sm:$0xff] }
 0x198   : > { %v1419_v28 = vrot.slane %v1416_v62, 4  ;;  %v2245_v57 = vcombine.high %v1873_v50, %v1873_v50  ;;  %v2244_v5 = vcombine.low %v1873_v50, %v1873_v50  ;;  %v1710_v16 = vrot.slane %v1705_v31, %v2719_v3 }
 0x199   : > { %1126 = vmatprep.subr.bf16.mxu1 %v2175_v60  ;;  %2154 = vmatmul.mubr.msk.bf16.vlgmr.msra.gmra.mxu0 %vm645_vm9, %v590_v53 }
 0x19a   : > { %v1421_v63 = vsel %vm299_vm8, %v1419_v28, %v1420_v59  ;;  %v1726_v6 = vpop.permute.xlu1 %1725  ;;  %1127 = vmatpush1.bf16.msra.mxu1 %v2174_v61  ;;  %1558 = vmatpush1.bf16.msra.mxu0 %v1546_v0 }
 0x19b   : > { %v1422_v47 = vsel %vm1198_vm2, %v1416_v62, %v1421_v63  ;;  %v1368_v7 = vpop.permute.xlu0 %1367  ;;  %2246 = vmatprep.subr.msk.bf16.mxu1 %vm299_vm8, %v2245_v57  ;;  %1583 = vmatprep.mubr.bf16.mxu0 %v2529_v1  ;;  %v1728_v24 = vrot.slane %v1726_v6, 4 }
 0x19c   : > { %v2211_v12 = vcombine.low %v1422_v47, %v2930_v10  ;;  %v2212_v13 = vcombine.high %v1422_v47, %v2930_v10  ;;  %v1371_v14 = vrot.slane %v1368_v7, 4  ;;  %v1936_v10 = vsel %vm299_vm8, %v2244_v5, 0 }
 0x19d   : > { %2185 = vmatmul.mubr.msk.bf16.vlgmr.msra.gmra.mxu1 %vm645_vm9, %v2173_v15 }
 0x19e   : > { %v1373_v8 = vsel %vm299_vm8, %v1371_v14, %v1372_v38  ;;  %1559 = vmatprep.subr.bf16.mxu0 %v2212_v13  ;;  %v1775_v4 = vpop.permute.xlu1 %1774  ;;  %1948 = vmatpush1.bf16.msra.mxu1 %v1936_v10 }
 0x19f   : > { %v1375_v18 = vsel %vm1374_vm0, %v1368_v7, %v1373_v8  ;;  %v1724_v9 = vpop.permute.xlu0 %1723  ;;  %1560 = vmatpush1.bf16.msra.mxu0 %v2211_v12  ;;  %1949 = vmatprep.subr.bf16.mxu1 %v2243_v19  ;;  %v1777_v27 = vrot.slane %v1775_v4, 4  ;;  %v1697_v19 = vpack.i.b16 %v1696_v54, %v1696_v54  ;;  %v1592_v54 = vld [vmem:[#allocation2] sm:$0xff] }
 0x1a0   : > { %v2209_v20 = vcombine.low %v2944_v21, %v1375_v18  ;;  %v2210_v22 = vcombine.high %v2944_v21, %v1375_v18  ;;  %v1727_v23 = vrot.slane %v1724_v9, 4  ;;  %1973 = vmatprep.mubr.bf16.mxu1 %v2529_v1  ;;  %v1593_v1 = vld [vmem:[#allocation7 + $0x8] sm:$0x11] }
 0x1a1   : > { %v2217_v40 = vcombine.low %v1593_v1, %v1593_v1  ;;  %v1702_v33 = vrot.slane %v1697_v19, %v2719_v3  ;;  %v2204_v19 = vld [vmem:[%s3108_s1 + $0x2] sm:$0x1] }
 0x1a2   : > { %1561 = vmatprep.subr.bf16.mxu0 %v2210_v22  ;;  %v1258_v26 = vpop.permute.xlu1 %1257  ;;  %v1729_v29 = vsel %vm299_vm8, %v1727_v23, %v1728_v24  ;;  %1950 = vmatpush1.bf16.msra.mxu1 %v2242_v32  ;;  %v2218_v32 = vcombine.high %v1593_v1, %v1593_v1 }
 0x1a3   : > { %v1773_v58 = vpop.permute.xlu0 %1772  ;;  %1562 = vmatpush1.bf16.msra.mxu0 %v2209_v20  ;;  %v1730_v34 = vsel %vm426_vm10, %v1724_v9, %v1729_v29  ;;  %v1260_v41 = vrot.slane %v1258_v26, 4  ;;  %v2225_v50 = vcombine.low %v1702_v33, %v1710_v16  ;;  %v1600_v52 = vshrl.u32 %v2217_v40, 16 }
 0x1a4   : > { %v1776_v21 = vrot.slane %v1773_v58, 4  ;;  %v1608_v62 = vshrl.u32 %v2218_v32, 16 }
 0x1a5   : > { %v1717_v5 = vmul.bf16 %v2225_v50, %v1688_v55  ;;  %v1601_v6 = vpack.i.b16 %v1600_v52, %v1600_v52 }
 0x1a6   : > { %v1778_v30 = vsel %vm299_vm8, %v1776_v21, %v1777_v27  ;;  %v1307_v36 = vpop.permute.xlu1 %1306  ;;  %v1609_v0 = vpack.i.b16 %v1608_v62, %v1608_v62 }
 0x1a7   : > { %v1779_v35 = vsel %vm1684_vm12, %v1773_v58, %v1778_v30  ;;  %v1256_v11 = vpop.permute.xlu0 %1255  ;;  %v1309_v44 = vrot.slane %v1307_v36, 4  ;;  %v1606_v8 = vrot.slane %v1601_v6, %v2719_v3 }
 0x1a8   : > { %v2240_v37 = vcombine.low %v1730_v34, %v1779_v35  ;;  %v2241_v39 = vcombine.high %v1730_v34, %v1779_v35  ;;  %v1259_v56 = vrot.slane %v1256_v11, 4  ;;  %v1614_v2 = vrot.slane %v1609_v0, %v2719_v3  ;;  %v2235_v34 = vld [vmem:[%s3108_s1 + $0x3] sm:$0x1] }
 0x1aa   : > { %1951 = vmatprep.subr.bf16.mxu1 %v2241_v39  ;;  %v1680_v42 = vpop.permute.xlu1 %1679  ;;  %v1261_v46 = vsel %vm299_vm8, %v1259_v56, %v1260_v41  ;;  %v2219_v22 = vcombine.low %v1606_v8, %v1614_v2 }
 0x1ab   : > { %1952 = vmatpush1.bf16.msra.mxu1 %v2240_v37  ;;  %v1305_v43 = vpop.permute.xlu0 %1304  ;;  %v1263_v45 = vsel %vm1262_vm13, %v1256_v11, %v1261_v46  ;;  %v1682_v57 = vrot.slane %v1680_v42, 4 }
 0x1ac   : > { %v1308_v48 = vrot.slane %v1305_v43, 4  ;;  %v1621_v29 = vmul.bf16 %v2219_v22, %v1592_v54 }
 0x1ae   : > { %v1310_v49 = vsel %vm299_vm8, %v1308_v48, %v1309_v44  ;;  %v1194_v28 = vpop.permute.xlu1 %1193 }
 0x1af   : > { %v1312_v59 = vsel %vm1311_vm1, %v1305_v43, %v1310_v49  ;;  %v1678_v53 = vpop.permute.xlu0 %1677  ;;  %v1196_v15 = vrot.slane %v1194_v28, 4 }
 0x1b0   : > { %v2207_v60 = vcombine.low %v1263_v45, %v1312_v59  ;;  %v2208_v61 = vcombine.high %v1263_v45, %v1312_v59  ;;  %v1681_v63 = vrot.slane %v1678_v53, 4 }
 0x1b2   : > { %v1683_v47 = vsel %vm299_vm8, %v1681_v63, %v1682_v57  ;;  %1563 = vmatprep.subr.bf16.mxu0 %v2208_v61  ;;  %v1209_v51 = vpop.permute.xlu1 %1208 }
 0x1b3   : > { %v1685_v7 = vsel %vm1684_vm12, %v1678_v53, %v1683_v47  ;;  %1564 = vmatpush1.bf16.msra.mxu0 %v2207_v60  ;;  %v1192_v38 = vpop.permute.xlu0 %1191  ;;  %v1211_v18 = vrot.slane %v1209_v51, 4 }
 0x1b4   : > { %v2238_v12 = vcombine.low %v1685_v7, %v1717_v5  ;;  %v2239_v13 = vcombine.high %v1685_v7, %v1717_v5  ;;  %v1195_v14 = vrot.slane %v1192_v38, 4 }
 0x1b6   : > { %1953 = vmatprep.subr.bf16.mxu1 %v2239_v13  ;;  %v1197_v4 = vsel %vm299_vm8, %v1195_v14, %v1196_v15  ;;  %v1630_v9 = vpop.permute.xlu1 %1629 }
 0x1b7   : > { %1954 = vmatpush1.bf16.msra.mxu1 %v2238_v12  ;;  %v1207_v17 = vpop.permute.xlu0 %1206  ;;  %v1199_v23 = vsel %vm1198_vm2, %v1192_v38, %v1197_v4  ;;  %v1632_v26 = vrot.slane %v1630_v9, 4 }
 0x1b8   : > { %v1210_v10 = vrot.slane %v1207_v17, 4 }
 0x1ba   : > { %v1212_v20 = vsel %vm299_vm8, %v1210_v10, %v1211_v18 }
 0x1bb   : > { %v1214_v24 = vsel %vm1213_vm7, %v1207_v17, %v1212_v20  ;;  %v1628_v25 = vpop.permute.xlu0 %1627  ;;  %vm2000_vm7 = vcmask 1041408  }
 0x1bc   : > { %v2205_v58 = vcombine.low %v1199_v23, %v1214_v24  ;;  %v2206_v27 = vcombine.high %v1199_v23, %v1214_v24  ;;  %v1631_v3 = vrot.slane %v1628_v25, 4 }
 0x1be   : > { %v1633_v21 = vsel %vm299_vm8, %v1631_v3, %v1632_v26  ;;  %1565 = vmatprep.subr.bf16.mxu0 %v2206_v27 }
 0x1bf   : > { %v1634_v30 = vsel %vm426_vm10, %v1628_v25, %v1633_v21  ;;  %1566 = vmatpush1.bf16.msra.mxu0 %v2205_v58  ;;  %vm2005_vm10 = vcmask 1045504  }
 0x1c0   : > { %v2236_v31 = vcombine.low %v1621_v29, %v1634_v30  ;;  %v2237_v1 = vcombine.high %v1621_v29, %v1634_v30 }
 0x1c2   : > { %2216 = vmatmul.mubr.msk.bf16.vlgmr.msra.gmra.mxu0 %vm645_vm9, %v2204_v19  ;;  %1955 = vmatprep.subr.bf16.mxu1 %v2237_v1 }
 0x1c3   : > { %1956 = vmatpush1.bf16.msra.mxu1 %v2236_v31 }
 0x1c6   : > { %2247 = vmatmul.mubr.msk.bf16.vlgmr.msra.gmra.mxu1 %vm645_vm9, %v2235_v34 }
 0x1c8   : > { %v2012_v52 = vpop.permute.xlu0 %2011 }
 0x259   : > { %v690_v35 = vpop.f32.mrf.mxu0 }
 0x25b   : > { %v692_v36 = vpop.f32.mrf.mxu0 }
 0x25d   : > { %v1146_v11 = vpop.f32.mrf.mxu1  ;;  %v694_v37 = vpop.f32.mrf.mxu0 }
 0x25e   : > { %v1984_v16 = vrot.slane %v1146_v11, 6 }
 0x25f   : > { %v1148_v39 = vpop.f32.mrf.mxu1  ;;  %v695_v56 = vpop.f32.mrf.mxu0 }
 0x260   : > { %v1985_v43 = vrot.slane %v1148_v39, 6  ;;  %v2001_v49 = vsel %vm2000_vm7, %v690_v35, %v1984_v16 }
 0x261   : > { %v1150_v40 = vpop.f32.mrf.mxu1 }
 0x262   : > { %v2002_v28 = vsel %vm2000_vm7, %v692_v36, %v1985_v43 }
 0x263   : > { %v1151_v41 = vpop.f32.mrf.mxu1 }
 0x282   : > { %v1585_v33 = vpop.f32.mrf.mxu0 }
 0x283   : > { %v1990_v32 = vrot.slane %v1585_v33, 4 }
 0x284   : > { %v1587_v42 = vpop.f32.mrf.mxu0 }
 0x285   : > { %v1991_v44 = vrot.slane %v1587_v42, 4  ;;  %v2003_v59 = vsel %vm299_vm8, %v2001_v49, %v1990_v32 }
 0x286   : > { %v1589_v46 = vpop.f32.mrf.mxu0  ;;  %v1975_v48 = vpop.f32.mrf.mxu1 }
 0x287   : > { %v1996_v50 = vrot.slane %v1975_v48, 2  ;;  %v2004_v57 = vsel %vm299_vm8, %v2002_v28, %v1991_v44 }
 0x288   : > { %v1590_v62 = vpop.f32.mrf.mxu0  ;;  %v1977_v45 = vpop.f32.mrf.mxu1 }
 0x289   : > { %v1997_v55 = vrot.slane %v1977_v45, 2  ;;  %v2006_v53 = vsel %vm2005_vm10, %v2003_v59, %v1996_v50 }
 0x28a   : > { %v2014_v60 = vadd.f32 %v2012_v52, %v2006_v53  ;;  %v1979_v61 = vpop.f32.mrf.mxu1 }
 0x28b   : > { %v2007_v63 = vsel %vm2005_vm10, %v2004_v57, %v1997_v55 }
 0x28c   : > { %v2015_v5 = vadd.f32 %v2012_v52, %v2007_v63  ;;  %2016 = vst [vmem:[%s228_s29] sm:$0xff] %v2014_v60  ;;  %v1980_v47 = vpop.f32.mrf.mxu1 }
 0x28e   : > { %2017 = vst [vmem:[%s228_s29 + $0x8] sm:$0xff] %v2015_v5 }
 0x28f   : > { %2468 = shalt.err (!%p2465_p0)
}
 0x290   : > { %s2469_s6 = scalar_lea.hbm %s2031_s5, 256  ;;  %s2473_s24 = scalar_lea.hbm %s3111_s4, 512 }
 0x291   : > { %p2470_p5 = scmp.ne.s32.totalorder %s2031_s5, %s2469_s6  ;;  %p2474_p1 = scmp.lt.s32.totalorder %s2031_s5, %s3111_s4 }
 0x292   : > { %p2475_p4 = scmp.lt.s32.totalorder %s2473_s24, %s2469_s6 }
 0x293   : > { %p2471_p9 = pnand %p2470_p5, %p3127_p3 }
 0x294   : > { %p2476_p6 = por %p2475_p4, %p2474_p1 }
 0x295   : > { %p2472_p12 = pneg %p2471_p9 }
 0x297   : > { %p2477_p8 = pnand %p2476_p6, %p2472_p12 }
 0x299   : > { %2480 = shalt.err (!%p2477_p8)
}
 0x29a   : > { %2262 = dma.vmem_to_hbm [thread:$0]  (%p3127_p3), %s2034_s20, 256, %s2031_s5, %s2019_s19  }
 0x29b PF: > { %s2045_s12 = sand.u32 1, %s2511_s15   ;;  %p3128_p11 = scmp.ne.s32.totalorder %s3117_s22, 0 }
 0x29c   : > { %p3129_p7 = scmp.ge.s32.totalorder %s2523_s18, 2  ;;  %s2046_s13 = scalar_lea.sflag [#allocation6], %s2045_s12 }
 0x29e   : > { %p2273_p10 = pnand %p3129_p7, %p3128_p11 }
 0x2a0   : > { %p2274_p2 = pneg %p2273_p10 }
 0x2a2   : > { %2506 = dma.done.wait (%p2274_p2), %s2046_s13, 256  }
 0x2a3   : > { %2508 = vsyncadd (%p2274_p2), %s2046_s13, 4294967040  ;;  %p18_p13 = scmp.ge.s32.totalorder %s2646_s27, 4   ;;  %s3130_s15 = smov %s2515_s16 }
 0x2a4   : > { %s3131_s16 = smov %s2519_s17  ;;  %s3132_s17 = smov %s2663_s9 }
 0x2a5   : > { %s3133_s18 = smov %s2646_s27  ;;  %20 = sbr.rel (!%p18_p13) target bundleno = 6 (0x6), region = 88 }
 0x2aa   :  { %2051 = vsyncpa [#allocation5], 1 }
 0x2ab   :  { %2053 = vsyncpa [#allocation5 + $0x1], 1 }
 0x2ac   :  { %2054 = vsyncpa [#allocation8], 1 }
 0x2ad   :  { %2055 = vsyncpa [#allocation6], 1 }
 0x2ae   :  { %2057 = vsyncpa [#allocation6 + $0x1], 1 }

</bundles_post_ra>
